<compile_context>
chip_gen: v5e
topology: v5e:2x2
jax: 0.10.0
libtpu: 0.0.40
codegen_flags: <defaults>
</compile_context>

<pallas_src>
import functools

import jax
import jax.numpy as jnp
from jax.experimental import pallas as pl
from jax.experimental.pallas import tpu as pltpu


# ---------------------------------------------------------------------------
# Kernel 1: fused QKV projection   qkv = x @ [Wq*scale | Wk | Wv]   (bf16 out)
# ---------------------------------------------------------------------------
def _qkv_proj_kernel(x_ref, w_ref, o_ref, acc_ref):
    @pl.when(pl.program_id(1) == 0)
    def _init():
        acc_ref[...] = jnp.zeros_like(acc_ref)

    acc_ref[...] += jnp.dot(x_ref[...], w_ref[...],
                            preferred_element_type=jnp.float32)

    @pl.when(pl.program_id(1) == pl.num_programs(1) - 1)
    def _store():
        o_ref[...] = acc_ref[...].astype(o_ref.dtype)


def qkv_projection(x2d, w_qkv, *, tm=256, tk=256):
    """x2d: (M, C) bf16, w_qkv: (C, 3D) bf16 -> (M, 3D) bf16."""
    M, C = x2d.shape
    _, N3 = w_qkv.shape
    tm = min(tm, M)
    tk = min(tk, C)
    assert M % tm == 0 and C % tk == 0

    return pl.pallas_call(
        _qkv_proj_kernel,
        out_shape=jax.ShapeDtypeStruct((M, N3), jnp.bfloat16),
        grid_spec=pltpu.PrefetchScalarGridSpec(
            num_scalar_prefetch=0,
            grid=(M // tm, C // tk),
            in_specs=[
                pl.BlockSpec((tm, tk), lambda i, k: (i, k)),
                pl.BlockSpec((tk, N3), lambda i, k: (k, 0)),
            ],
            out_specs=pl.BlockSpec((tm, N3), lambda i, k: (i, 0)),
            scratch_shapes=[pltpu.VMEM((tm, N3), jnp.float32)],
        ),
        compiler_params=pltpu.CompilerParams(
            dimension_semantics=("parallel", "arbitrary")),
    )(x2d, w_qkv)


# ---------------------------------------------------------------------------
# Kernel 2: flash-style causal multi-head attention over pre-projected q/k/v
# ---------------------------------------------------------------------------
def _mha_flash_kernel(q_ref, k_ref, v_ref, o_ref, m_s, l_s, acc_s,
                      *, n_head, head_size, block_q, block_k):
    """Grid = (B, n_q_tiles, n_kv_tiles); KV axis is the (arbitrary) reduction.

    q_ref : (block_q, D) bf16   pre-scaled q tile (all heads, lane-dense)
    k_ref : (block_k, D) bf16   k tile
    v_ref : (block_k, D) bf16   v tile
    o_ref : (block_q, D) bf16   output tile
    m_s,l_s: (n_head, block_q, 1) f32   online-softmax running max / sum
    acc_s : (block_q, D) f32            output accumulator
    """
    qi = pl.program_id(1)
    ki = pl.program_id(2)

    # --- init once per q tile ---------------------------------------------
    @pl.when(ki == 0)
    def _init():
        m_s[...] = jnp.full_like(m_s, -jnp.inf)
        l_s[...] = jnp.zeros_like(l_s)
        acc_s[...] = jnp.zeros_like(acc_s)

    def _update(masked):
        k = k_ref[...]
        v = v_ref[...]
        if masked:
            # local lower-triangular mask; only valid because block_q==block_k
            r = jax.lax.broadcasted_iota(jnp.int32, (block_q, block_k), 0)
            c = jax.lax.broadcasted_iota(jnp.int32, (block_q, block_k), 1)
            causal = c <= r
        for h in range(n_head):
            sl = slice(h * head_size, (h + 1) * head_size)
            # scores: contract the last dims directly (no XLU transpose)
            s = jax.lax.dot_general(
                q_ref[:, sl], k[:, sl],
                (((1,), (1,)), ((), ())),
                preferred_element_type=jnp.float32)            # (bq, bk)
            if masked:
                s = jnp.where(causal, s, -jnp.inf)
            m_prev = m_s[h]                                     # (bq, 1)
            m_new = jnp.maximum(m_prev, jnp.max(s, axis=-1, keepdims=True))
            alpha = jnp.exp(m_prev - m_new)
            p = jnp.exp(s - m_new)
            l_s[h] = alpha * l_s[h] + jnp.sum(p, axis=-1, keepdims=True)
            acc_s[:, sl] = alpha * acc_s[:, sl] + jnp.dot(
                p.astype(jnp.bfloat16), v[:, sl],
                preferred_element_type=jnp.float32)
            m_s[h] = m_new

    # --- strictly below the diagonal: no mask work ---------------------------
    @pl.when(ki < qi)
    def _below_diag():
        _update(masked=False)

    # --- diagonal tile: masked update, then finalize -------------------------
    # (tiles with ki > qi are fully masked -> skipped entirely; their KV
    #  index_map is clamped to the diagonal so no DMA is issued either)
    @pl.when(ki == qi)
    def _diag_and_finalize():
        _update(masked=True)
        # TODO(synk): running stats could be packed (block_q, n_head) and the
        # finalize collapsed to one full-width store; per-head 128-lane-aligned
        # stores are already unmasked so the win is small.
        for h in range(n_head):
            sl = slice(h * head_size, (h + 1) * head_size)
            inv_l = pl.reciprocal(l_s[h], approx=True)          # EUP vrcp
            o_ref[:, sl] = (acc_s[:, sl] * inv_l).astype(o_ref.dtype)


def fused_mha_heads(x, wk_stack, wq_stack, wv_stack, *, block_q=256, block_k=256):
    """x: (B, T, C) f32.  w*_stack: (n_head, head_size, C) PyTorch-layout weights.

    Returns concat_h(Head_h(x)) with shape (B, T, n_head*head_size), bf16.
    """
    B, T, C = x.shape
    n_head, head_size, c2 = wk_stack.shape
    assert c2 == C
    D = n_head * head_size

    block_q = min(block_q, T)
    block_k = min(block_k, T)
    assert block_q == block_k, "skip/finalize predicates require square tiles"
    assert T % block_q == 0

    # Faithful to a.py: Head scales by C**-0.5 where C = n_embd (intentional).
    scale = float(C) ** -0.5

    def fuse(w_stack):  # (n_head, H, C) PyTorch layout -> (C, n_head*H)
        return jnp.transpose(w_stack, (2, 0, 1)).reshape(C, D)

    # Fold the score scale into the Q weight columns (done once, in f32).
    w_qkv = jnp.concatenate(
        [fuse(wq_stack) * scale, fuse(wk_stack), fuse(wv_stack)],
        axis=1).astype(jnp.bfloat16)                            # (C, 3D)

    # Hoisted projection: computed once per token, not once per (q tile, kv tile).
    qkv = qkv_projection(x.astype(jnp.bfloat16).reshape(B * T, C), w_qkv)
    qkv = qkv.reshape(B, T, 3 * D)

    n_q = T // block_q
    n_k = T // block_k

    kernel = functools.partial(
        _mha_flash_kernel,
        n_head=n_head, head_size=head_size,
        block_q=block_q, block_k=block_k)

    return pl.pallas_call(
        kernel,
        out_shape=jax.ShapeDtypeStruct((B, T, D), jnp.bfloat16),
        grid_spec=pltpu.PrefetchScalarGridSpec(
            num_scalar_prefetch=0,
            grid=(B, n_q, n_k),
            in_specs=[
                # q tile: column block 0 of the fused qkv tensor
                pl.BlockSpec((None, block_q, D),
                             lambda b, qi, ki: (b, qi, 0)),
                # k tile: column block 1; clamp row block to the diagonal so
                # skipped (ki > qi) steps keep the resident block (no DMA)
                pl.BlockSpec((None, block_k, D),
                             lambda b, qi, ki: (b, jnp.minimum(ki, qi), 1)),
                # v tile: column block 2, same clamping
                pl.BlockSpec((None, block_k, D),
                             lambda b, qi, ki: (b, jnp.minimum(ki, qi), 2)),
            ],
            out_specs=pl.BlockSpec((None, block_q, D),
                                   lambda b, qi, ki: (b, qi, 0)),
            scratch_shapes=[
                pltpu.VMEM((n_head, block_q, 1), jnp.float32),  # running max
                pltpu.VMEM((n_head, block_q, 1), jnp.float32),  # running sum
                pltpu.VMEM((block_q, D), jnp.float32),          # output accum
            ],
        ),
        compiler_params=pltpu.CompilerParams(
            dimension_semantics=("parallel", "parallel", "arbitrary")),
    )(qkv, qkv, qkv)


# ---------------------------------------------------------------------------
# Pure-JAX f32 reference: cat([Head_h(x) for h], dim=-1)
# ---------------------------------------------------------------------------
def mha_heads_reference(x, wk_stack, wq_stack, wv_stack):
    B, T, C = x.shape
    tril = jnp.tril(jnp.ones((T, T), dtype=bool))
    outs = []
    for h in range(wk_stack.shape[0]):
        k = x @ wk_stack[h].T
        q = x @ wq_stack[h].T
        v = x @ wv_stack[h].T
        wei = (q @ jnp.swapaxes(k, -2, -1)) * (float(C) ** -0.5)
        wei = jnp.where(tril, wei, -jnp.inf)
        wei = jax.nn.softmax(wei, axis=-1)
        outs.append(wei @ v)
    return jnp.concatenate(outs, axis=-1)


if __name__ == "__main__":
    # Small shapes consistent with the module (head_size = n_embd // n_head),
    # sized so per-head slices are 128-lane-aligned and all kernel paths
    # (below-diagonal, diagonal finalize, skipped upper-triangle) run:
    # B=2, T=512, n_embd=256, n_head=2 -> head_size=128, 256x256 tiles.
    B, T = 2, 512
    n_embd = 256
    n_head = 2
    head_size = n_embd // n_head

    key = jax.random.PRNGKey(0)
    kx, kk, kq, kv = jax.random.split(key, 4)

    x = jax.random.normal(kx, (B, T, n_embd), dtype=jnp.float32)
    # deterministic "Linear" weights, PyTorch layout (out_features, in_features)
    wk = jax.random.normal(kk, (n_head, head_size, n_embd), dtype=jnp.float32) * 0.02
    wq = jax.random.normal(kq, (n_head, head_size, n_embd), dtype=jnp.float32) * 0.02
    wv = jax.random.normal(kv, (n_head, head_size, n_embd), dtype=jnp.float32) * 0.02

    out = fused_mha_heads(x, wk, wq, wv, block_q=256, block_k=256)
    out = jax.block_until_ready(out)

    ref = mha_heads_reference(x, wk, wq, wv)
    assert out.shape == (B, T, n_head * head_size), out.shape
    out_f32 = out.astype(jnp.float32)
    max_err = float(jnp.max(jnp.abs(out_f32 - ref)))
    # bf16 MXU operands / bf16 output / approx reciprocal -> loosened tolerance
    assert jnp.allclose(out_f32, ref, atol=3e-2, rtol=3e-2), max_err

    print("KERNEL_OK")
</pallas_src>

<mosaic_0001>
module attributes {stable_mosaic.version = 11 : i64} {
  func.func @_qkv_proj_kernel(%arg0: i32, %arg1: i32, %arg2: memref<256x256xbf16, #tpu.memory_space<vmem>>, %arg3: memref<256x768xbf16, #tpu.memory_space<vmem>>, %arg4: memref<256x768xbf16, #tpu.memory_space<vmem>>, %arg5: memref<256x768xf32, #tpu.memory_space<vmem>>) attributes {dimension_semantics = [#tpu.dimension_semantics<parallel>, #tpu.dimension_semantics<arbitrary>], iteration_bounds = array<i64: 4, 1>, scalar_prefetch = 0 : i64, scratch_operands = 1 : i64, tpu.core_type = #tpu.core_type<tc>, window_params = [{transform_indices = @transform_0, window_bounds = array<i64: 256, 256>}, {transform_indices = @transform_1, window_bounds = array<i64: 256, 768>}, {transform_indices = @transform_2, window_bounds = array<i64: 256, 768>}]} {
    %c0_i32 = arith.constant 0 : i32
    %0 = arith.cmpi eq, %arg1, %c0_i32 : i32
    %1 = arith.extui %0 : i1 to i32
    %c0_i32_0 = arith.constant 0 : i32
    %2 = arith.cmpi ne, %1, %c0_i32_0 : i32
    scf.if %2 {
      %cst_10 = arith.constant 0.000000e+00 : f32
      %12 = vector.broadcast %cst_10 : f32 to vector<256x768xf32>
      %c0_11 = arith.constant 0 : index
      %c0_12 = arith.constant 0 : index
      %13 = vector.load %arg5[%c0_11, %c0_12] : memref<256x768xf32, #tpu.memory_space<vmem>>, vector<256x768xf32>
      tpu.vector_store %arg5[%c0_11, %c0_12], %12 {strides = array<i32>} : memref<256x768xf32, #tpu.memory_space<vmem>>, vector<256x768xf32>,
    } else {
    }
    %c0 = arith.constant 0 : index
    %c0_1 = arith.constant 0 : index
    %3 = vector.load %arg5[%c0, %c0_1] : memref<256x768xf32, #tpu.memory_space<vmem>>, vector<256x768xf32>
    %c0_2 = arith.constant 0 : index
    %c0_3 = arith.constant 0 : index
    %4 = vector.load %arg2[%c0_2, %c0_3] : memref<256x256xbf16, #tpu.memory_space<vmem>>, vector<256x256xbf16>
    %c0_4 = arith.constant 0 : index
    %c0_5 = arith.constant 0 : index
    %5 = vector.load %arg3[%c0_4, %c0_5] : memref<256x768xbf16, #tpu.memory_space<vmem>>, vector<256x768xbf16>
    %cst = arith.constant dense<0.000000e+00> : vector<256x768xf32>
    %6 = tpu.matmul %4, %5, %cst {dimension_numbers = #tpu.dot_dimension_numbers<[1], [0], [0], [1], [0, 0, 1, 1], [], []>} : vector<256x256xbf16>, vector<256x768xbf16>, vector<256x768xf32> -> vector<256x768xf32>
    %7 = arith.addf %3, %6 : vector<256x768xf32>
    %c0_6 = arith.constant 0 : index
    %c0_7 = arith.constant 0 : index
    %8 = vector.load %arg5[%c0_6, %c0_7] : memref<256x768xf32, #tpu.memory_space<vmem>>, vector<256x768xf32>
    tpu.vector_store %arg5[%c0_6, %c0_7], %7 {strides = array<i32>} : memref<256x768xf32, #tpu.memory_space<vmem>>, vector<256x768xf32>,
    %c0_i32_8 = arith.constant 0 : i32
    %9 = arith.cmpi eq, %arg1, %c0_i32_8 : i32
    %10 = arith.extui %9 : i1 to i32
    %c0_i32_9 = arith.constant 0 : i32
    %11 = arith.cmpi ne, %10, %c0_i32_9 : i32
    scf.if %11 {
      %c0_10 = arith.constant 0 : index
      %c0_11 = arith.constant 0 : index
      %12 = vector.load %arg5[%c0_10, %c0_11] : memref<256x768xf32, #tpu.memory_space<vmem>>, vector<256x768xf32>
      %13 = arith.truncf %12 : vector<256x768xf32> to vector<256x768xbf16>
      %c0_12 = arith.constant 0 : index
      %c0_13 = arith.constant 0 : index
      %14 = vector.load %arg4[%c0_12, %c0_13] : memref<256x768xbf16, #tpu.memory_space<vmem>>, vector<256x768xbf16>
      tpu.vector_store %arg4[%c0_12, %c0_13], %13 {strides = array<i32>} : memref<256x768xbf16, #tpu.memory_space<vmem>>, vector<256x768xbf16>,
    } else {
    }
    return
  }
  func.func @transform_0(%arg0: i32, %arg1: i32) -> (i32, i32) {
    %c0_i32 = arith.constant 0 : i32
    return %arg0, %arg1 : i32, i32
  }
  func.func @transform_1(%arg0: i32, %arg1: i32) -> (i32, i32) {
    %c0_i32 = arith.constant 0 : i32
    %c0_i32_0 = arith.constant 0 : i32
    return %arg1, %c0_i32 : i32, i32
  }
  func.func @transform_2(%arg0: i32, %arg1: i32) -> (i32, i32) {
    %c0_i32 = arith.constant 0 : i32
    %c0_i32_0 = arith.constant 0 : i32
    return %arg0, %c0_i32 : i32, i32
  }
}

</mosaic_0001>

<bundles_post_ra>
// kernel: tpu_custom_call.1
= control target key start
LH: loop header
LB: loop body
LE: loop exit
PB: predicated region body
PF: predicated region fallthrough
CT: control target
= control target key end

     0   :  { %7 = vsyncpa [#allocation4], 0  ;;  %s4798_s0 = inlined_call_operand.hbm [shape: bf16[1024,256], index: 0, kind: input, shape index: {}]   ;;  %s4799_s1 = inlined_call_operand.hbm [shape: bf16[256,768], index: 1, kind: input, shape index: {}]   ;;  %s4800_s2 = inlined_call_operand.hbm [shape: bf16[1024,768], index: 2, kind: output, shape index: {}]  }
   0x1   :  { %9 = vsyncpa [#allocation4 + $0x1], 0 }
   0x2   :  { %10 = vsyncpa [#allocation7], 0 }
   0x3   :  { %11 = vsyncpa [#allocation5], 0 }
   0x4   :  { %13 = vsyncpa [#allocation5 + $0x1], 0  ;;  %s4229_s9 = smov 0   ;;  %s4231_s10 = smov 0  }
   0x5   :  { %s4233_s11 = smov 0   ;;  %s4235_s12 = smov 0  }
   0x6   :  { %s4237_s13 = smov 0   ;;  %s4239_s14 = smov 0  }
   0x7 LB: > { %s3319_s15 = sadd.s32 4294967295, %s4205_s14   ;;  %s3320_s16 = sadd.s32 4294967294, %s4205_s14   ;;  %s4205_s14 = sphi %s4239_s14, %s19_s14   ;;  %s4201_s13 = sphi %s4237_s13, %s4812_s13   ;;  %s4197_s12 = sphi %s4235_s12, %s4811_s12   ;;  %s4193_s11 = sphi %s4233_s11, %s4810_s11   ;;  %s4189_s10 = sphi %s4231_s10, %s4809_s10   ;;  %s4185_s9 = sphi %s4229_s9, %s4808_s9  }
   0x8   : > { %p53_p0 = scmp.ne.s32.totalorder %s4189_s10, %s4185_s9  ;;  %p4263_p1 = scmp.eq.s32.totalorder %s3319_s15, 0 }
   0x9   : > { %p4267_p2 = scmp.eq.s32.totalorder %s3319_s15, 3  ;;  %p109_p3 = scmp.eq.s32.totalorder %s3320_s16, 3 }
   0xa   : > { %p4273_p4 = por %p4263_p1, %p53_p0  ;;  %p3321_p5 = scmp.ge.s32.totalorder %s4205_s14, 1 }
   0xb   : > { %p4278_p6 = por %p109_p3, %p53_p0  ;;  %p116_p7 = scmp.lt.s32.totalorder %s4205_s14, 5 }
   0xc   : > { %s131_s23 = sshll.u32 %s4799_s1, 4  ;;  %s4207_s25 = smov [#allocation6]   ;;  %s132_s23 = int_to_ptr.hbm [resolvable:$true] %s131_s23 }
   0xd   : > { %p4286_p8 = pnand %p3321_p5, %p116_p7  ;;  %s133_s26 = sshll.u32 %s4207_s25, 4  ;;  %s134_s26 = int_to_ptr.vmem [resolvable:$true] %s133_s26 }
   0xe   : > { %s4208_s27 = smov 384   ;;  %s4209_s28 = smov 24  }
   0xf   : > { %p3988_p9 = pneg %p4286_p8  ;;  %s31_s29 = sadd.s32 1, %s4201_s13 }
  0x10   : > { %p33_p11 = scmp.ge.s32.totalorder %s31_s29, 4  ;;  %s40_s30 = sadd.s32 1, %s4193_s11 }
  0x11   : > { %p3989_p10 = pnand %p3988_p9, %p4263_p1  ;;  %p47_p12 = scmp.ne.s32.totalorder %s4193_s11, %s4189_s10 }
  0x12   : > { %p48_p13 = scmp.eq.s32.totalorder %s4205_s14, 0  ;;  %s4814_s29 = smov (%p33_p11, %s31_s29), 0 }
  0x13   : > { %3991 = dma.hbm_to_vmem [thread:$0]  (!%p3989_p10), %s132_s23, 12288, %s134_s26, [#allocation7], %s4208_s27, %s4208_s27, %s4209_s28  }
  0x14   : > { %p4301_p0 = por %p48_p13, %p47_p12  ;;  %p4307_p3 = por %p4267_p2, %p47_p12 }
  0x15   : > { %s35_s5 = ssub.s32 %s4201_s13, %s4814_s29  ;;  %p4001_p5 = scmp.lt.s32.totalorder %s4205_s14, 4 }
  0x16   : > { %p38_p7 = scmp.eq.s32.totalorder %s35_s5, 0  ;;  %s147_s6 = sand.u32 1, %s4193_s11  }
  0x17   : > { %s3324_s7 = sshll.u32 %s147_s6, 8  ;;  %s3849_s15 = sshll.u32 %s4201_s13, 8 }
  0x18   : > { %s4316_s8 = scalar_select %p38_p7, %s4193_s11, %s40_s30  }
  0x19   : > { %s159_s22 = scalar_lea.hbm %s4798_s0, %s3849_s15  ;;  %s151_s23 = scalar_lea.vmem [#allocation3], %s3324_s7 }
  0x1a   : > { %s162_s25 = sshll.u32 %s151_s23, 4  ;;  %s160_s18 = sshll.u32 %s159_s22, 4  ;;  %s163_s25 = int_to_ptr.vmem [resolvable:$true] %s162_s25  ;;  %s161_s18 = int_to_ptr.hbm [resolvable:$true] %s160_s18 }
  0x1b   : > { %p3993_p2 = pnand %p4001_p5, %p4301_p0  ;;  %s148_s26 = scalar_lea.sflag [#allocation4], %s147_s6 }
  0x1c   : > { %s4210_s27 = smov 128   ;;  %s4211_s28 = smov 8  }
  0x1d   : > { %3995 = dma.hbm_to_vmem [thread:$0]  (!%p3993_p2), %s161_s18, 4096, %s163_s25, %s148_s26, %s4210_s27, %s4210_s27, %s4211_s28  }
  0x1e   : > { %174 = sbr.rel (%p4286_p8) target bundleno = 975 (0x3cf), region = 28  ;;  %s4327_s30 = sand.u32 (!%p4286_p8), 1, %s4189_s10  }
  0x1f   : > { %s3329_s5 = sshll.u32 (!%p4286_p8), %s4327_s30, 8  ;;  %s177_s7 = scalar_lea.sflag (!%p4286_p8), [#allocation4], %s4327_s30 }
  0x20   : > { %s4331_s15 = scalar_lea.vmem (!%p4286_p8), [#allocation3], %s3329_s5 }
  0x23   : > { %4172 = dma.done.wait (%p4273_p4), %s177_s7, 4096  }
  0x24   : > { %4174 = vsyncadd (%p4273_p4), %s177_s7, 4294963200 }
  0x25   : > { %4176 = dma.done.wait (%p4263_p1), [#allocation7], 12288  }
  0x26   : > { %4178 = vsyncadd (%p4263_p1), [#allocation7], 4294955008  ;;  %v3629_v0 = vld [vmem:[#allocation6 + $0x150] sm:$0xf]  ;;  %v3927_v1 = vld [vmem:[#allocation6 + $0x164] sm:$0xf0] }
  0x27   : > { %v3821_v2 = vld [vmem:[#allocation6 + $0x2d0] sm:$0xf]  ;;  %v3630_v3 = vor.u32 %v3927_v1, %v3629_v0  ;;  %v3975_v4 = vld [vmem:[#allocation6 + $0x2e4] sm:$0xf0]  ;;  %v3924_v5 = vld [vmem:[#allocation6 + $0x154] sm:$0xf] }
  0x28   : > { %v3631_v6 = vld [vmem:[#allocation6 + $0x168] sm:$0xf0]  ;;  %v3822_v7 = vor.u32 %v3975_v4, %v3821_v2  ;;  %v3972_v9 = vld [vmem:[#allocation6 + $0x2d4] sm:$0xf]  ;;  %v3605_v11 = vld [vmem:[#allocation6 + $0x120] sm:$0xf] }
  0x29   : > { %v3634_v8 = vor.u32 %v3924_v5, %v3631_v6  ;;  %v3823_v10 = vld [vmem:[#allocation6 + $0x2e8] sm:$0xf0]  ;;  %1367 = vmatpush.bf16.msra.mxu0 %v3630_v3  ;;  %v3921_v13 = vld [vmem:[#allocation6 + $0x134] sm:$0xf0]  ;;  %v3797_v14 = vld [vmem:[#allocation6 + $0x2a0] sm:$0xf] }
  0x2a   : > { %v3826_v12 = vor.u32 %v3972_v9, %v3823_v10  ;;  %v3969_v15 = vld [vmem:[#allocation6 + $0x2b4] sm:$0xf0]  ;;  %1456 = vmatpush.bf16.msra.mxu1 %v3822_v7  ;;  %v3606_v16 = vor.u32 %v3921_v13, %v3605_v11  ;;  %v3918_v18 = vld [vmem:[#allocation6 + $0x124] sm:$0xf]  ;;  %v3607_v19 = vld [vmem:[#allocation6 + $0x138] sm:$0xf0] }
  0x2b   : > { %1545 = vmatpush.bf16.msra.mxu2 %v3634_v8  ;;  %v3798_v17 = vor.u32 %v3969_v15, %v3797_v14  ;;  %v3966_v20 = vld [vmem:[#allocation6 + $0x2a4] sm:$0xf]  ;;  %v3610_v21 = vor.u32 %v3918_v18, %v3607_v19  ;;  %v3799_v22 = vld [vmem:[#allocation6 + $0x2b8] sm:$0xf0]  ;;  %v3581_v23 = vld [vmem:[#allocation6 + $0xf0] sm:$0xf] }
  0x2c   : > { %1634 = vmatpush.bf16.msra.mxu3 %v3826_v12  ;;  %v3915_v24 = vld [vmem:[#allocation6 + $0x104] sm:$0xf0]  ;;  %v3802_v25 = vor.u32 %v3966_v20, %v3799_v22  ;;  %v3773_v26 = vld [vmem:[#allocation6 + $0x270] sm:$0xf]  ;;  %v3912_v28 = vld [vmem:[#allocation6 + $0xf4] sm:$0xf] }
  0x2d   : > { %v3963_v27 = vld [vmem:[#allocation6 + $0x284] sm:$0xf0]  ;;  %1368 = vmatpush.bf16.msra.mxu0 %v3606_v16  ;;  %v3582_v29 = vor.u32 %v3915_v24, %v3581_v23  ;;  %v3583_v30 = vld [vmem:[#allocation6 + $0x108] sm:$0xf0]  ;;  %v3960_v31 = vld [vmem:[#allocation6 + $0x274] sm:$0xf] }
  0x2e   : > { %v3775_v32 = vld [vmem:[#allocation6 + $0x288] sm:$0xf0]  ;;  %1457 = vmatpush.bf16.msra.mxu1 %v3798_v17  ;;  %v3774_v33 = vor.u32 %v3963_v27, %v3773_v26  ;;  %v3586_v34 = vor.u32 %v3912_v28, %v3583_v30  ;;  %v3557_v35 = vld [vmem:[#allocation6 + $0xc0] sm:$0xf]  ;;  %v3909_v36 = vld [vmem:[#allocation6 + $0xd4] sm:$0xf0] }
  0x2f   : > { %1546 = vmatpush.bf16.msra.mxu2 %v3610_v21  ;;  %v3749_v37 = vld [vmem:[#allocation6 + $0x240] sm:$0xf]  ;;  %v3778_v38 = vor.u32 %v3960_v31, %v3775_v32  ;;  %v3957_v39 = vld [vmem:[#allocation6 + $0x254] sm:$0xf0]  ;;  %v3906_v40 = vld [vmem:[#allocation6 + $0xc4] sm:$0xf]  ;;  %v3558_v44 = vor.u32 %v3909_v36, %v3557_v35 }
  0x30   : > { %1635 = vmatpush.bf16.msra.mxu3 %v3802_v25  ;;  %v3559_v41 = vld [vmem:[#allocation6 + $0xd8] sm:$0xf0]  ;;  %v3954_v42 = vld [vmem:[#allocation6 + $0x244] sm:$0xf]  ;;  %v3750_v45 = vor.u32 %v3957_v39, %v3749_v37  ;;  %v3533_v47 = vld [vmem:[#allocation6 + $0x90] sm:$0xf] }
  0x31   : > { %v3751_v43 = vld [vmem:[#allocation6 + $0x258] sm:$0xf0]  ;;  %1369 = vmatpush.bf16.msra.mxu0 %v3582_v29  ;;  %v3562_v46 = vor.u32 %v3906_v40, %v3559_v41  ;;  %v3903_v48 = vld [vmem:[#allocation6 + $0xa4] sm:$0xf0]  ;;  %v3725_v49 = vld [vmem:[#allocation6 + $0x210] sm:$0xf] }
  0x32   : > { %1458 = vmatpush.bf16.msra.mxu1 %v3774_v33  ;;  %v3754_v50 = vor.u32 %v3954_v42, %v3751_v43  ;;  %v3951_v51 = vld [vmem:[#allocation6 + $0x224] sm:$0xf0]  ;;  %v3900_v52 = vld [vmem:[#allocation6 + $0x94] sm:$0xf]  ;;  %v3535_v53 = vld [vmem:[#allocation6 + $0xa8] sm:$0xf0]  ;;  %v3534_v56 = vor.u32 %v3903_v48, %v3533_v47 }
  0x33   : > { %1547 = vmatpush.bf16.msra.mxu2 %v3586_v34  ;;  %v3948_v54 = vld [vmem:[#allocation6 + $0x214] sm:$0xf]  ;;  %v3727_v55 = vld [vmem:[#allocation6 + $0x228] sm:$0xf0]  ;;  %v3726_v57 = vor.u32 %v3951_v51, %v3725_v49  ;;  %v3538_v58 = vor.u32 %v3900_v52, %v3535_v53  ;;  %v3509_v59 = vld [vmem:[#allocation6 + $0x60] sm:$0xf] }
  0x34   : > { %1636 = vmatpush.bf16.msra.mxu3 %v3778_v38  ;;  %v3897_v60 = vld [vmem:[#allocation6 + $0x74] sm:$0xf0]  ;;  %v3701_v61 = vld [vmem:[#allocation6 + $0x1e0] sm:$0xf]  ;;  %v3730_v62 = vor.u32 %v3948_v54, %v3727_v55  ;;  %v3894_v0 = vld [vmem:[#allocation6 + $0x64] sm:$0xf] }
  0x35   : > { %1370 = vmatpush.bf16.msra.mxu0 %v3558_v44  ;;  %v3945_v63 = vld [vmem:[#allocation6 + $0x1f4] sm:$0xf0]  ;;  %v3511_v1 = vld [vmem:[#allocation6 + $0x78] sm:$0xf0]  ;;  %v3942_v2 = vld [vmem:[#allocation6 + $0x1e4] sm:$0xf]  ;;  %v3510_v4 = vor.u32 %v3897_v60, %v3509_v59 }
  0x36   : > { %1459 = vmatpush.bf16.msra.mxu1 %v3750_v45  ;;  %v3703_v3 = vld [vmem:[#allocation6 + $0x1f8] sm:$0xf0]  ;;  %v3702_v5 = vor.u32 %v3945_v63, %v3701_v61  ;;  %v3514_v6 = vor.u32 %v3894_v0, %v3511_v1  ;;  %v3485_v7 = vld [vmem:[#allocation6 + $0x30] sm:$0xf]  ;;  %v3891_v8 = vld [vmem:[#allocation6 + $0x44] sm:$0xf0] }
  0x37   : > { %1548 = vmatpush.bf16.msra.mxu2 %v3562_v46  ;;  %v3677_v9 = vld [vmem:[#allocation6 + $0x1b0] sm:$0xf]  ;;  %v3706_v10 = vor.u32 %v3942_v2, %v3703_v3  ;;  %v3939_v11 = vld [vmem:[#allocation6 + $0x1c4] sm:$0xf0]  ;;  %v3888_v12 = vld [vmem:[#allocation6 + $0x34] sm:$0xf]  ;;  %v3486_v16 = vor.u32 %v3891_v8, %v3485_v7 }
  0x38   : > { %1637 = vmatpush.bf16.msra.mxu3 %v3754_v50  ;;  %v3487_v13 = vld [vmem:[#allocation6 + $0x48] sm:$0xf0]  ;;  %v3936_v14 = vld [vmem:[#allocation6 + $0x1b4] sm:$0xf]  ;;  %v3461_v17 = vld [vmem:[#allocation6] sm:$0xf]  ;;  %v3678_v19 = vor.u32 %v3939_v11, %v3677_v9 }
  0x39   : > { %1371 = vmatpush.bf16.msra.mxu0 %v3534_v56  ;;  %v3679_v15 = vld [vmem:[#allocation6 + $0x1c8] sm:$0xf0]  ;;  %v3885_v18 = vld [vmem:[#allocation6 + $0x14] sm:$0xf0]  ;;  %v3490_v20 = vor.u32 %v3888_v12, %v3487_v13  ;;  %v3653_v21 = vld [vmem:[#allocation6 + $0x180] sm:$0xf] }
  0x3a   : > { %1460 = vmatpush.bf16.msra.mxu1 %v3726_v57  ;;  %v3933_v22 = vld [vmem:[#allocation6 + $0x194] sm:$0xf0]  ;;  %v3882_v23 = vld [vmem:[#allocation6 + $0x4] sm:$0xf]  ;;  %v3682_v24 = vor.u32 %v3936_v14, %v3679_v15  ;;  %v3463_v25 = vld [vmem:[#allocation6 + $0x18] sm:$0xf0]  ;;  %v3462_v31 = vor.u32 %v3885_v18, %v3461_v17 }
  0x3b   : > { %1549 = vmatpush.bf16.msra.mxu2 %v3538_v58  ;;  %v3930_v26 = vld [vmem:[#allocation6 + $0x184] sm:$0xf]  ;;  %v3655_v27 = vld [vmem:[#allocation6 + $0x198] sm:$0xf0]  ;;  %v3333_v28 = vld [vmem:[%s4331_s15] sm:$0xf]  ;;  %v3654_v35 = vor.u32 %v3933_v22, %v3653_v21  ;;  %v3466_v36 = vor.u32 %v3882_v23, %v3463_v25 }
  0x3c   : > { %1638 = vmatpush.bf16.msra.mxu3 %v3730_v62  ;;  %v3925_v29 = vld [vmem:[#allocation6 + $0x15c] sm:$0xf]  ;;  %v3639_v30 = vld [vmem:[#allocation6 + $0x170] sm:$0xf0]  ;;  %v3851_v32 = vld [vmem:[%s4331_s15 + $0x4] sm:$0xf0]  ;;  %v3658_v39 = vor.u32 %v3930_v26, %v3655_v27 }
  0x3d   : > { %1372 = vmatpush.bf16.msra.mxu0 %v3510_v4  ;;  %v3973_v33 = vld [vmem:[#allocation6 + $0x2dc] sm:$0xf]  ;;  %v3831_v34 = vld [vmem:[#allocation6 + $0x2f0] sm:$0xf0]  ;;  %v3850_v37 = vld [vmem:[%s4331_s15 + $0x4] sm:$0xf]  ;;  %v3642_v40 = vor.u32 %v3925_v29, %v3639_v30  ;;  %v4345_v43 = vor.u32 %v3851_v32, %v3333_v28 }
  0x3e   : > { %1461 = vmatpush.bf16.msra.mxu1 %v3702_v5  ;;  %v3335_v38 = vld [vmem:[%s4331_s15 + $0x8] sm:$0xf0]  ;;  %v3637_v41 = vld [vmem:[#allocation6 + $0x158] sm:$0xf]  ;;  %v3928_v42 = vld [vmem:[#allocation6 + $0x16c] sm:$0xf0]  ;;  %v3834_v44 = vor.u32 %v3973_v33, %v3831_v34 }
  0x3f   : > { %1550 = vmatpush.bf16.msra.mxu2 %v3514_v6  ;;  %v3829_v45 = vld [vmem:[#allocation6 + $0x2d8] sm:$0xf]  ;;  %v3976_v46 = vld [vmem:[#allocation6 + $0x2ec] sm:$0xf0]  ;;  %v4347_v47 = vor.u32 %v3850_v37, %v3335_v38  ;;  %v3638_v48 = vor.u32 %v3928_v42, %v3637_v41  ;;  %v3919_v50 = vld [vmem:[#allocation6 + $0x12c] sm:$0xf] }
  0x40   : > { %1639 = vmatpush.bf16.msra.mxu3 %v3706_v10  ;;  %v3830_v49 = vor.u32 %v3976_v46, %v3829_v45  ;;  %v3615_v51 = vld [vmem:[#allocation6 + $0x140] sm:$0xf0]  ;;  %v3967_v52 = vld [vmem:[#allocation6 + $0x2ac] sm:$0xf]  ;;  %v3613_v55 = vld [vmem:[#allocation6 + $0x128] sm:$0xf] }
  0x41   : > { %1373 = vmatpush.bf16.msra.mxu0 %v3486_v16  ;;  %v3618_v53 = vor.u32 %v3919_v50, %v3615_v51  ;;  %v3807_v54 = vld [vmem:[#allocation6 + $0x2c0] sm:$0xf0]  ;;  %v3922_v56 = vld [vmem:[#allocation6 + $0x13c] sm:$0xf0]  ;;  %v3805_v59 = vld [vmem:[#allocation6 + $0x2a8] sm:$0xf] }
  0x42   : > { %1462 = vmatpush.bf16.msra.mxu1 %v3678_v19  ;;  %v3810_v57 = vor.u32 %v3967_v52, %v3807_v54  ;;  %v3614_v58 = vor.u32 %v3922_v56, %v3613_v55  ;;  %v3970_v60 = vld [vmem:[#allocation6 + $0x2bc] sm:$0xf0]  ;;  %v3341_v62 = vld [vmem:[%s4331_s15 + $0x10] sm:$0xf]  ;;  %v3853_v63 = vld [vmem:[%s4331_s15 + $0x14] sm:$0xf0] }
  0x43   : > { %1551 = vmatpush.bf16.msra.mxu2 %v3490_v20  ;;  %v3806_v61 = vor.u32 %v3970_v60, %v3805_v59  ;;  %v3852_v0 = vld [vmem:[%s4331_s15 + $0x14] sm:$0xf]  ;;  %v3343_v1 = vld [vmem:[%s4331_s15 + $0x18] sm:$0xf0]  ;;  %v4357_v2 = vor.u32 %v3853_v63, %v3341_v62  ;;  %v3349_v4 = vld [vmem:[%s4331_s15 + $0x20] sm:$0xf] }
  0x44   : > { %1640 = vmatpush.bf16.msra.mxu3 %v3682_v24  ;;  %v4359_v3 = vor.u32 %v3852_v0, %v3343_v1  ;;  %v3855_v5 = vld [vmem:[%s4331_s15 + $0x24] sm:$0xf0]  ;;  %v3854_v6 = vld [vmem:[%s4331_s15 + $0x24] sm:$0xf]  ;;  %v3351_v7 = vld [vmem:[%s4331_s15 + $0x28] sm:$0xf0] }
  0x45   : > { %1374 = vmatpush.bf16.msra.mxu0 %v3462_v31  ;;  %v4369_v8 = vor.u32 %v3855_v5, %v3349_v4  ;;  %v4371_v9 = vor.u32 %v3854_v6, %v3351_v7  ;;  %v3913_v10 = vld [vmem:[#allocation6 + $0xfc] sm:$0xf]  ;;  %v3591_v11 = vld [vmem:[#allocation6 + $0x110] sm:$0xf0]  ;;  %v3589_v15 = vld [vmem:[#allocation6 + $0xf8] sm:$0xf] }
  0x46   : > { %1463 = vmatpush.bf16.msra.mxu1 %v3654_v35  ;;  %v3961_v12 = vld [vmem:[#allocation6 + $0x27c] sm:$0xf]  ;;  %v3594_v13 = vor.u32 %v3913_v10, %v3591_v11  ;;  %v3783_v14 = vld [vmem:[#allocation6 + $0x290] sm:$0xf0]  ;;  %v3916_v16 = vld [vmem:[#allocation6 + $0x10c] sm:$0xf0] }
  0x47   : > { %1552 = vmatpush.bf16.msra.mxu2 %v3466_v36  ;;  %v3786_v17 = vor.u32 %v3961_v12, %v3783_v14  ;;  %v3590_v18 = vor.u32 %v3916_v16, %v3589_v15  ;;  %v3781_v19 = vld [vmem:[#allocation6 + $0x278] sm:$0xf]  ;;  %v3964_v20 = vld [vmem:[#allocation6 + $0x28c] sm:$0xf0]  ;;  %v3856_v24 = vld [vmem:[%s4331_s15 + $0x34] sm:$0xf] }
  0x48   : > { %1641 = vmatpush.bf16.msra.mxu3 %v3658_v39  ;;  %1375 = vmatmul.bf16.vlgmr.msra.gmra.mxu0 %v4345_v43  ;;  %v3782_v21 = vor.u32 %v3964_v20, %v3781_v19  ;;  %v3357_v22 = vld [vmem:[%s4331_s15 + $0x30] sm:$0xf]  ;;  %v3857_v23 = vld [vmem:[%s4331_s15 + $0x34] sm:$0xf0]  ;;  %v3359_v25 = vld [vmem:[%s4331_s15 + $0x38] sm:$0xf0] }
  0x49   : > { %1464 = vmatmul.bf16.vlgmr.msra.gmra.mxu1 %v4347_v47  ;;  %1723 = vmatpush.bf16.msrb.mxu0 %v3638_v48  ;;  %v4381_v26 = vor.u32 %v3857_v23, %v3357_v22  ;;  %v4383_v27 = vor.u32 %v3856_v24, %v3359_v25  ;;  %v3365_v28 = vld [vmem:[%s4331_s15 + $0x40] sm:$0xf]  ;;  %v3859_v29 = vld [vmem:[%s4331_s15 + $0x44] sm:$0xf0]  ;;  %v3858_v30 = vld [vmem:[%s4331_s15 + $0x44] sm:$0xf] }
  0x4a   : > { %1553 = vmatmul.bf16.vlgmr.msra.gmra.mxu2 %v4345_v43  ;;  %1812 = vmatpush.bf16.msrb.mxu1 %v3830_v49  ;;  %v3367_v31 = vld [vmem:[%s4331_s15 + $0x48] sm:$0xf0]  ;;  %v4393_v32 = vor.u32 %v3859_v29, %v3365_v28  ;;  %v3567_v35 = vld [vmem:[#allocation6 + $0xe0] sm:$0xf0]  ;;  %v3565_v39 = vld [vmem:[#allocation6 + $0xc8] sm:$0xf] }
  0x4b   : > { %1901 = vmatpush.bf16.msrb.mxu2 %v3642_v40  ;;  %1642 = vmatmul.bf16.vlgmr.msra.gmra.mxu3 %v4347_v47  ;;  %v4395_v33 = vor.u32 %v3858_v30, %v3367_v31  ;;  %v3907_v34 = vld [vmem:[#allocation6 + $0xcc] sm:$0xf]  ;;  %v3759_v38 = vld [vmem:[#allocation6 + $0x260] sm:$0xf0]  ;;  %v3910_v40 = vld [vmem:[#allocation6 + $0xdc] sm:$0xf0] }
  0x4c   : > { %1990 = vmatpush.bf16.msrb.mxu3 %v3834_v44  ;;  %v3955_v36 = vld [vmem:[#allocation6 + $0x24c] sm:$0xf]  ;;  %v3570_v37 = vor.u32 %v3907_v34, %v3567_v35  ;;  %v3566_v42 = vor.u32 %v3910_v40, %v3565_v39  ;;  %v3757_v44 = vld [vmem:[#allocation6 + $0x248] sm:$0xf]  ;;  %v3958_v45 = vld [vmem:[#allocation6 + $0x25c] sm:$0xf0] }
  0x4d   : > { %1724 = vmatpush.bf16.msrb.mxu0 %v3614_v58  ;;  %v3762_v41 = vor.u32 %v3955_v36, %v3759_v38  ;;  %v3758_v46 = vor.u32 %v3958_v45, %v3757_v44  ;;  %v3373_v48 = vld [vmem:[%s4331_s15 + $0x50] sm:$0xf]  ;;  %v3861_v49 = vld [vmem:[%s4331_s15 + $0x54] sm:$0xf0]  ;;  %v3860_v50 = vld [vmem:[%s4331_s15 + $0x54] sm:$0xf] }
  0x4e   : > { %1813 = vmatpush.bf16.msrb.mxu1 %v3806_v61  ;;  %v3375_v51 = vld [vmem:[%s4331_s15 + $0x58] sm:$0xf0]  ;;  %v4405_v52 = vor.u32 %v3861_v49, %v3373_v48  ;;  %v3381_v54 = vld [vmem:[%s4331_s15 + $0x60] sm:$0xf]  ;;  %v3863_v55 = vld [vmem:[%s4331_s15 + $0x64] sm:$0xf0] }
  0x4f   : > { %1902 = vmatpush.bf16.msrb.mxu2 %v3618_v53  ;;  %v4407_v53 = vor.u32 %v3860_v50, %v3375_v51  ;;  %v3862_v56 = vld [vmem:[%s4331_s15 + $0x64] sm:$0xf]  ;;  %v4417_v58 = vor.u32 %v3863_v55, %v3381_v54  ;;  %v3901_v60 = vld [vmem:[#allocation6 + $0x9c] sm:$0xf]  ;;  %v3543_v61 = vld [vmem:[#allocation6 + $0xb0] sm:$0xf0] }
  0x50   : > { %1991 = vmatpush.bf16.msrb.mxu3 %v3810_v57  ;;  %v3383_v57 = vld [vmem:[%s4331_s15 + $0x68] sm:$0xf0]  ;;  %v3949_v62 = vld [vmem:[#allocation6 + $0x21c] sm:$0xf]  ;;  %v3546_v63 = vor.u32 %v3901_v60, %v3543_v61  ;;  %v3735_v0 = vld [vmem:[#allocation6 + $0x230] sm:$0xf0] }
  0x51   : > { %1725 = vmatpush.bf16.msrb.mxu0 %v3590_v18  ;;  %v4419_v59 = vor.u32 %v3862_v56, %v3383_v57  ;;  %v3738_v1 = vor.u32 %v3949_v62, %v3735_v0  ;;  %v3389_v4 = vld [vmem:[%s4331_s15 + $0x70] sm:$0xf]  ;;  %v3865_v5 = vld [vmem:[%s4331_s15 + $0x74] sm:$0xf0]  ;;  %v3864_v6 = vld [vmem:[%s4331_s15 + $0x74] sm:$0xf] }
  0x52   : > { %1814 = vmatpush.bf16.msrb.mxu1 %v3782_v21  ;;  %v3391_v7 = vld [vmem:[%s4331_s15 + $0x78] sm:$0xf0]  ;;  %v3541_v10 = vld [vmem:[#allocation6 + $0x98] sm:$0xf]  ;;  %v3904_v11 = vld [vmem:[#allocation6 + $0xac] sm:$0xf0]  ;;  %v4429_v15 = vor.u32 %v3865_v5, %v3389_v4 }
  0x53   : > { %1903 = vmatpush.bf16.msrb.mxu2 %v3594_v13  ;;  %v3733_v12 = vld [vmem:[#allocation6 + $0x218] sm:$0xf]  ;;  %v3542_v13 = vor.u32 %v3904_v11, %v3541_v10  ;;  %v3952_v14 = vld [vmem:[#allocation6 + $0x22c] sm:$0xf0]  ;;  %v3397_v18 = vld [vmem:[%s4331_s15 + $0x80] sm:$0xf] }
  0x54   : > { %1992 = vmatpush.bf16.msrb.mxu3 %v3786_v17  ;;  %v3734_v16 = vor.u32 %v3952_v14, %v3733_v12  ;;  %v4431_v17 = vor.u32 %v3864_v6, %v3391_v7  ;;  %v3867_v19 = vld [vmem:[%s4331_s15 + $0x84] sm:$0xf0]  ;;  %v3866_v20 = vld [vmem:[%s4331_s15 + $0x84] sm:$0xf]  ;;  %v3399_v21 = vld [vmem:[%s4331_s15 + $0x88] sm:$0xf0] }
  0x55   : > { %1726 = vmatpush.bf16.msrb.mxu0 %v3566_v42  ;;  %v4441_v22 = vor.u32 %v3867_v19, %v3397_v18  ;;  %v4443_v24 = vor.u32 %v3866_v20, %v3399_v21  ;;  %v3895_v28 = vld [vmem:[#allocation6 + $0x6c] sm:$0xf]  ;;  %v3519_v29 = vld [vmem:[#allocation6 + $0x80] sm:$0xf0]  ;;  %s3978_s17 = smul.u32 768, %s4327_s30  ;;  %s4139_s27 = scalar_lea.hbm %s4800_s2, 3072 }
  0x56   : > { %1815 = vmatpush.bf16.msrb.mxu1 %v3758_v46  ;;  %v3943_v30 = vld [vmem:[#allocation6 + $0x1ec] sm:$0xf]  ;;  %v3522_v31 = vor.u32 %v3895_v28, %v3519_v29  ;;  %v3711_v34 = vld [vmem:[#allocation6 + $0x200] sm:$0xf0]  ;;  %v3405_v44 = vld [vmem:[%s4331_s15 + $0x90] sm:$0xf] }
  0x57   : > { %1904 = vmatpush.bf16.msrb.mxu2 %v3570_v37  ;;  %v3714_v37 = vor.u32 %v3943_v30, %v3711_v34  ;;  %v3869_v45 = vld [vmem:[%s4331_s15 + $0x94] sm:$0xf0]  ;;  %v3868_v46 = vld [vmem:[%s4331_s15 + $0x94] sm:$0xf]  ;;  %v3407_v48 = vld [vmem:[%s4331_s15 + $0x98] sm:$0xf0] }
  0x58   : > { %1380 = vmatmul.bf16.gmra.mxu0 %v4357_v2  ;;  %1993 = vmatpush.bf16.msrb.mxu3 %v3762_v41  ;;  %s4454_s19 = scalar_lea.vmem [#allocation8], %s3978_s17  ;;  %v3517_v49 = vld [vmem:[#allocation6 + $0x68] sm:$0xf]  ;;  %v3898_v50 = vld [vmem:[#allocation6 + $0x7c] sm:$0xf0]  ;;  %v4457_v57 = vor.u32 %v3869_v45, %v3405_v44  ;;  %s3979_s24 = smul.u32 768, %s4197_s12 }
  0x59   : > { %1469 = vmatmul.bf16.gmra.mxu1 %v4359_v3  ;;  %1727 = vmatpush.bf16.msrb.mxu0 %v3542_v13  ;;  %v3709_v51 = vld [vmem:[#allocation6 + $0x1e8] sm:$0xf]  ;;  %v3518_v54 = vor.u32 %v3898_v50, %v3517_v49  ;;  %v3946_v55 = vld [vmem:[#allocation6 + $0x1fc] sm:$0xf0]  ;;  %v3870_v19 = vld [vmem:[%s4331_s15 + $0xa4] sm:$0xf] }
  0x5a   : > { %1558 = vmatmul.bf16.gmra.mxu2 %v4357_v2  ;;  %1816 = vmatpush.bf16.msrb.mxu1 %v3734_v16  ;;  %v3710_v60 = vor.u32 %v3946_v55, %v3709_v51  ;;  %v3413_v16 = vld [vmem:[%s4331_s15 + $0xa0] sm:$0xf]  ;;  %v3871_v18 = vld [vmem:[%s4331_s15 + $0xa4] sm:$0xf0]  ;;  %v3415_v20 = vld [vmem:[%s4331_s15 + $0xa8] sm:$0xf0]  ;;  %s3219_s16 = scalar_lea.hbm %s4800_s2, %s3979_s24 }
  0x5b   : > { %1647 = vmatmul.bf16.gmra.mxu3 %v4359_v3  ;;  %1905 = vmatpush.bf16.msrb.mxu2 %v3546_v63  ;;  %v4459_v63 = vor.u32 %v3868_v46, %v3407_v48  ;;  %v4473_v29 = vor.u32 %v3870_v19, %v3415_v20  ;;  %v3421_v51 = vld [vmem:[%s4331_s15 + $0xb0] sm:$0xf]  ;;  %v3872_v55 = vld [vmem:[%s4331_s15 + $0xb4] sm:$0xf]  ;;  %s3220_s21 = sshll.u32 %s4454_s19, 4  ;;  %s3222_s22 = sshll.u32 %s3219_s16, 4  ;;  %s3221_s21 = int_to_ptr.vmem [resolvable:$true] %s3220_s21  ;;  %s3223_s22 = int_to_ptr.hbm [resolvable:$true] %s3222_s22 }
  0x5c   : > { %1994 = vmatpush.bf16.msrb.mxu3 %v3738_v1  ;;  %s3207_s12 = scalar_lea.sflag [#allocation5], %s4327_s30  ;;  %s4133_s23 = sshra.s32 %s3223_s22, 4  ;;  %s4134_s23 = int_to_ptr.hbm [resolvable:$true] %s4133_s23 }
  0x5d   : > { %1728 = vmatpush.bf16.msrb.mxu0 %v3518_v54  ;;  %v3873_v54 = vld [vmem:[%s4331_s15 + $0xb4] sm:$0xf0]  ;;  %s4135_s25 = scalar_lea.hbm %s4134_s23, 768  ;;  %p4140_p9 = scmp.lt.s32.totalorder %s4134_s23, %s4800_s2 }
  0x5e   : > { %1817 = vmatpush.bf16.msrb.mxu1 %v3710_v60  ;;  %v3493_v60 = vld [vmem:[#allocation6 + $0x38] sm:$0xf]  ;;  %p4136_p1 = scmp.ne.s32.totalorder %s4134_s23, %s4135_s25  ;;  %p4141_p10 = scmp.lt.s32.totalorder %s4139_s27, %s4135_s25 }
  0x5f   : > { %1906 = vmatpush.bf16.msrb.mxu2 %v3522_v31 }
  0x60   : > { %1995 = vmatpush.bf16.msrb.mxu3 %v3714_v37  ;;  %v3495_v37 = vld [vmem:[#allocation6 + $0x50] sm:$0xf0]  ;;  %p4137_p4 = pnand %p4136_p1, %p4307_p3  ;;  %p4142_p11 = por %p4141_p10, %p4140_p9 }
  0x62   : > { %p4138_p8 = pneg %p4137_p4 }
  0x64   : > { %p4143_p12 = pnand %p4142_p11, %p4138_p8 }
  0x68   : > { %1385 = vmatmul.bf16.gmra.mxu0 %v4369_v8 }
  0x69   : > { %1474 = vmatmul.bf16.gmra.mxu1 %v4371_v9 }
  0x6a   : > { %1563 = vmatmul.bf16.gmra.mxu2 %v4369_v8 }
  0x6b   : > { %1652 = vmatmul.bf16.gmra.mxu3 %v4371_v9 }
  0x78   : > { %1390 = vmatmul.bf16.gmra.mxu0 %v4381_v26 }
  0x79   : > { %1479 = vmatmul.bf16.gmra.mxu1 %v4383_v27 }
  0x7a   : > { %1568 = vmatmul.bf16.gmra.mxu2 %v4381_v26 }
  0x7b   : > { %1657 = vmatmul.bf16.gmra.mxu3 %v4383_v27 }
  0x88   : > { %1395 = vmatmul.bf16.gmra.mxu0 %v4393_v32 }
  0x89   : > { %1484 = vmatmul.bf16.gmra.mxu1 %v4395_v33 }
  0x8a   : > { %1573 = vmatmul.bf16.gmra.mxu2 %v4393_v32 }
  0x8b   : > { %1662 = vmatmul.bf16.gmra.mxu3 %v4395_v33 }
  0x98   : > { %1400 = vmatmul.bf16.gmra.mxu0 %v4405_v52 }
  0x99   : > { %1489 = vmatmul.bf16.gmra.mxu1 %v4407_v53 }
  0x9a   : > { %1578 = vmatmul.bf16.gmra.mxu2 %v4405_v52 }
  0x9b   : > { %1667 = vmatmul.bf16.gmra.mxu3 %v4407_v53 }
  0xa8   : > { %1405 = vmatmul.bf16.gmra.mxu0 %v4417_v58 }
  0xa9   : > { %1494 = vmatmul.bf16.gmra.mxu1 %v4419_v59 }
  0xaa   : > { %1583 = vmatmul.bf16.gmra.mxu2 %v4417_v58 }
  0xab   : > { %1672 = vmatmul.bf16.gmra.mxu3 %v4419_v59 }
  0xb8   : > { %1410 = vmatmul.bf16.gmra.mxu0 %v4429_v15 }
  0xb9   : > { %1499 = vmatmul.bf16.gmra.mxu1 %v4431_v17 }
  0xba   : > { %1588 = vmatmul.bf16.gmra.mxu2 %v4429_v15 }
  0xbb   : > { %1677 = vmatmul.bf16.gmra.mxu3 %v4431_v17 }
  0xc5   : > { %v1376_v23 = vpop.f32.mrf.mxu0 }
  0xc6   : > { %v1465_v25 = vpop.f32.mrf.mxu1 }
  0xc7   : > { %v1466_v35 = vadd.f32 %v1465_v25, %v1376_v23  ;;  %v4471_v23 = vor.u32 %v3871_v18, %v3413_v16 }
  0xc8   : > { %1415 = vmatmul.bf16.gmra.mxu0 %v4441_v22 }
  0xc9   : > { %1504 = vmatmul.bf16.gmra.mxu1 %v4443_v24 }
  0xca   : > { %1593 = vmatmul.bf16.gmra.mxu2 %v4441_v22 }
  0xcb   : > { %1682 = vmatmul.bf16.gmra.mxu3 %v4443_v24 }
  0xcd   : > { %v1554_v36 = vpop.f32.mrf.mxu2  ;;  %v1378_v39 = vpop.f32.mrf.mxu0 }
  0xce   : > { %v1643_v38 = vpop.f32.mrf.mxu3  ;;  %v1467_v41 = vpop.f32.mrf.mxu1 }
  0xcf   : > { %v1644_v40 = vadd.f32 %v1643_v38, %v1554_v36  ;;  %v1468_v0 = vadd.f32 %v1467_v41, %v1378_v39  ;;  %v3889_v36 = vld [vmem:[#allocation6 + $0x3c] sm:$0xf] }
  0xd0   : > { %v3498_v38 = vor.u32 %v3889_v36, %v3495_v37  ;;  %v3937_v39 = vld [vmem:[#allocation6 + $0x1bc] sm:$0xf]  ;;  %v3431_v36 = vld [vmem:[%s4331_s15 + $0xc8] sm:$0xf0] }
  0xd1   : > { %v3014_v42 = vpack.c.bf16 %v1644_v40, %v1466_v35  ;;  %v3687_v40 = vld [vmem:[#allocation6 + $0x1d0] sm:$0xf0] }
  0xd2   : > { %v3690_v44 = vor.u32 %v3937_v39, %v3687_v40  ;;  %1907 = vmatpush.bf16.msrb.mxu2 %v3498_v38 }
  0xd3   : > { %3110 = vst [vmem:[%s4454_s19] sm:$0xff] %v3014_v42 }
  0xd4   : > { %1996 = vmatpush.bf16.msrb.mxu3 %v3690_v44 }
  0xd5   : > { %v1556_v56 = vpop.f32.mrf.mxu2  ;;  %v1381_v62 = vpop.f32.mrf.mxu0 }
  0xd6   : > { %v1645_v61 = vpop.f32.mrf.mxu3  ;;  %v1470_v4 = vpop.f32.mrf.mxu1 }
  0xd7   : > { %v1646_v1 = vadd.f32 %v1645_v61, %v1556_v56  ;;  %v1471_v6 = vadd.f32 %v1470_v4, %v1381_v62  ;;  %v3423_v56 = vld [vmem:[%s4331_s15 + $0xb8] sm:$0xf0]  ;;  %v3892_v61 = vld [vmem:[#allocation6 + $0x4c] sm:$0xf0] }
  0xd8   : > { %1420 = vmatmul.bf16.gmra.mxu0 %v4457_v57  ;;  %v3494_v62 = vor.u32 %v3892_v61, %v3493_v60 }
  0xd9   : > { %v3017_v5 = vpack.c.bf16 %v1646_v1, %v1468_v0  ;;  %1509 = vmatmul.bf16.gmra.mxu1 %v4459_v63  ;;  %v3685_v0 = vld [vmem:[#allocation6 + $0x1b8] sm:$0xf]  ;;  %v3940_v1 = vld [vmem:[#allocation6 + $0x1cc] sm:$0xf0] }
  0xda   : > { %1598 = vmatmul.bf16.gmra.mxu2 %v4457_v57  ;;  %1729 = vmatpush.bf16.msrb.mxu0 %v3494_v62 }
  0xdb   : > { %3113 = vst [vmem:[%s4454_s19 + $0x18] sm:$0xff] %v3017_v5  ;;  %1687 = vmatmul.bf16.gmra.mxu3 %v4459_v63  ;;  %v4485_v5 = vor.u32 %v3873_v54, %v3421_v51  ;;  %v3931_v51 = vld [vmem:[#allocation6 + $0x18c] sm:$0xf]  ;;  %v3663_v54 = vld [vmem:[#allocation6 + $0x1a0] sm:$0xf0] }
  0xdc   : > { %v3666_v60 = vor.u32 %v3931_v51, %v3663_v54  ;;  %v3878_v51 = vld [vmem:[%s4331_s15 + $0xe4] sm:$0xf]  ;;  %v3447_v54 = vld [vmem:[%s4331_s15 + $0xe8] sm:$0xf0] }
  0xdd   : > { %v1559_v7 = vpop.f32.mrf.mxu2  ;;  %v1383_v11 = vpop.f32.mrf.mxu0 }
  0xde   : > { %v1648_v10 = vpop.f32.mrf.mxu3  ;;  %v1472_v13 = vpop.f32.mrf.mxu1  ;;  %1997 = vmatpush.bf16.msrb.mxu3 %v3666_v60 }
  0xdf   : > { %v1649_v12 = vadd.f32 %v1648_v10, %v1559_v7  ;;  %v1473_v30 = vadd.f32 %v1472_v13, %v1383_v11  ;;  %v4487_v11 = vor.u32 %v3872_v55, %v3423_v56 }
  0xe1   : > { %v3020_v14 = vpack.c.bf16 %v1649_v12, %v1471_v6  ;;  %v3686_v6 = vor.u32 %v3940_v1, %v3685_v0 }
  0xe3   : > { %3116 = vst [vmem:[%s4454_s19 + $0x30] sm:$0xff] %v3020_v14  ;;  %1818 = vmatpush.bf16.msrb.mxu1 %v3686_v6  ;;  %v3437_v6 = vld [vmem:[%s4331_s15 + $0xd0] sm:$0xf] }
  0xe5   : > { %v1561_v21 = vpop.f32.mrf.mxu2  ;;  %v1386_v28 = vpop.f32.mrf.mxu0 }
  0xe6   : > { %v1650_v25 = vpop.f32.mrf.mxu3  ;;  %v1475_v34 = vpop.f32.mrf.mxu1 }
  0xe7   : > { %v1651_v31 = vadd.f32 %v1650_v25, %v1561_v21  ;;  %v1476_v41 = vadd.f32 %v1475_v34, %v1386_v28  ;;  %v3875_v34 = vld [vmem:[%s4331_s15 + $0xc4] sm:$0xf0] }
  0xe8   : > { %1425 = vmatmul.bf16.gmra.mxu0 %v4471_v23 }
  0xe9   : > { %v3023_v35 = vpack.c.bf16 %v1651_v31, %v1473_v30  ;;  %1514 = vmatmul.bf16.gmra.mxu1 %v4473_v29  ;;  %v3429_v31 = vld [vmem:[%s4331_s15 + $0xc0] sm:$0xf] }
  0xea   : > { %1603 = vmatmul.bf16.gmra.mxu2 %v4471_v23  ;;  %v4499_v38 = vor.u32 %v3875_v34, %v3429_v31 }
  0xeb   : > { %3119 = vst [vmem:[%s4454_s19 + $0x48] sm:$0xff] %v3023_v35  ;;  %1692 = vmatmul.bf16.gmra.mxu3 %v4473_v29  ;;  %v3874_v35 = vld [vmem:[%s4331_s15 + $0xc4] sm:$0xf] }
  0xed   : > { %v1564_v42 = vpop.f32.mrf.mxu2  ;;  %v1388_v46 = vpop.f32.mrf.mxu0 }
  0xee   : > { %v1653_v45 = vpop.f32.mrf.mxu3  ;;  %v1477_v49 = vpop.f32.mrf.mxu1 }
  0xef   : > { %v1654_v48 = vadd.f32 %v1653_v45, %v1564_v42  ;;  %v1478_v12 = vadd.f32 %v1477_v49, %v1388_v46  ;;  %v3471_v49 = vld [vmem:[#allocation6 + $0x20] sm:$0xf0] }
  0xf1   : > { %v3026_v50 = vpack.c.bf16 %v1654_v48, %v1476_v41  ;;  %v4501_v41 = vor.u32 %v3874_v35, %v3431_v36  ;;  %v3883_v48 = vld [vmem:[#allocation6 + $0xc] sm:$0xf] }
  0xf3   : > { %3122 = vst [vmem:[%s4454_s19 + $0x60] sm:$0xff] %v3026_v50  ;;  %v3474_v50 = vor.u32 %v3883_v48, %v3471_v49  ;;  %v3445_v49 = vld [vmem:[%s4331_s15 + $0xe0] sm:$0xf] }
  0xf5   : > { %v1566_v4 = vpop.f32.mrf.mxu2  ;;  %v1391_v10 = vpop.f32.mrf.mxu0  ;;  %1908 = vmatpush.bf16.msrb.mxu2 %v3474_v50  ;;  %v3879_v50 = vld [vmem:[%s4331_s15 + $0xe4] sm:$0xf0] }
  0xf6   : > { %v1655_v7 = vpop.f32.mrf.mxu3  ;;  %v1480_v14 = vpop.f32.mrf.mxu1 }
  0xf7   : > { %v1656_v13 = vadd.f32 %v1655_v7, %v1566_v4  ;;  %v1481_v18 = vadd.f32 %v1480_v14, %v1391_v10  ;;  %v3877_v7 = vld [vmem:[%s4331_s15 + $0xd4] sm:$0xf0]  ;;  %v3876_v10 = vld [vmem:[%s4331_s15 + $0xd4] sm:$0xf]  ;;  %v3886_v14 = vld [vmem:[#allocation6 + $0x1c] sm:$0xf0] }
  0xf8   : > { %1430 = vmatmul.bf16.gmra.mxu0 %v4485_v5 }
  0xf9   : > { %v3029_v16 = vpack.c.bf16 %v1656_v13, %v1478_v12  ;;  %1519 = vmatmul.bf16.gmra.mxu1 %v4487_v11  ;;  %v3439_v12 = vld [vmem:[%s4331_s15 + $0xd8] sm:$0xf0]  ;;  %v3469_v13 = vld [vmem:[#allocation6 + $0x8] sm:$0xf] }
  0xfa   : > { %1608 = vmatmul.bf16.gmra.mxu2 %v4485_v5  ;;  %v4515_v31 = vor.u32 %v3876_v10, %v3439_v12  ;;  %v3647_v10 = vld [vmem:[#allocation6 + $0x178] sm:$0xf0] }
  0xfb   : > { %3125 = vst [vmem:[%s4454_s19 + $0x78] sm:$0xff] %v3029_v16  ;;  %1697 = vmatmul.bf16.gmra.mxu3 %v4487_v11  ;;  %v3470_v16 = vor.u32 %v3886_v14, %v3469_v13  ;;  %v3974_v13 = vld [vmem:[#allocation6 + $0x2e4] sm:$0xf]  ;;  %v3839_v14 = vld [vmem:[#allocation6 + $0x2f8] sm:$0xf0] }
  0xfd   : > { %v1569_v19 = vpop.f32.mrf.mxu2  ;;  %v1393_v21 = vpop.f32.mrf.mxu0  ;;  %1730 = vmatpush.bf16.msrb.mxu0 %v3470_v16 }
  0xfe   : > { %v1658_v20 = vpop.f32.mrf.mxu3  ;;  %v1482_v28 = vpop.f32.mrf.mxu1 }
  0xff   : > { %v1659_v25 = vadd.f32 %v1658_v20, %v1569_v19  ;;  %v1483_v42 = vadd.f32 %v1482_v28, %v1393_v21  ;;  %v3934_v19 = vld [vmem:[#allocation6 + $0x19c] sm:$0xf0]  ;;  %v4513_v21 = vor.u32 %v3877_v7, %v3437_v6  ;;  %v3926_v7 = vld [vmem:[#allocation6 + $0x164] sm:$0xf] }
 0x100   : > { %v3650_v12 = vor.u32 %v3926_v7, %v3647_v10 }
 0x101   : > { %v3032_v30 = vpack.c.bf16 %v1659_v25, %v1481_v18  ;;  %v3661_v18 = vld [vmem:[#allocation6 + $0x188] sm:$0xf] }
 0x102   : > { %v3662_v25 = vor.u32 %v3934_v19, %v3661_v18  ;;  %v3842_v19 = vor.u32 %v3974_v13, %v3839_v14  ;;  %2257 = vmatpush.bf16.msra.mxu2 %v3650_v12 }
 0x103   : > { %3128 = vst [vmem:[%s4454_s19 + $0x90] sm:$0xff] %v3032_v30 }
 0x104   : > { %1819 = vmatpush.bf16.msrb.mxu1 %v3662_v25  ;;  %2346 = vmatpush.bf16.msra.mxu3 %v3842_v19 }
 0x105   : > { %v1571_v37 = vpop.f32.mrf.mxu2  ;;  %v1396_v40 = vpop.f32.mrf.mxu0 }
 0x106   : > { %v1660_v39 = vpop.f32.mrf.mxu3  ;;  %v1485_v45 = vpop.f32.mrf.mxu1 }
 0x107   : > { %v1661_v44 = vadd.f32 %v1660_v39, %v1571_v37  ;;  %v1486_v55 = vadd.f32 %v1485_v45, %v1396_v40 }
 0x108   : > { %1435 = vmatmul.bf16.gmra.mxu0 %v4499_v38 }
 0x109   : > { %v3035_v46 = vpack.c.bf16 %v1661_v44, %v1483_v42  ;;  %1524 = vmatmul.bf16.gmra.mxu1 %v4501_v41 }
 0x10a   : > { %1613 = vmatmul.bf16.gmra.mxu2 %v4499_v38 }
 0x10b   : > { %3131 = vst [vmem:[%s4454_s19 + $0xa8] sm:$0xff] %v3035_v46  ;;  %1702 = vmatmul.bf16.gmra.mxu3 %v4501_v41 }
 0x10d   : > { %v1574_v56 = vpop.f32.mrf.mxu2  ;;  %v1398_v62 = vpop.f32.mrf.mxu0 }
 0x10e   : > { %v1663_v61 = vpop.f32.mrf.mxu3  ;;  %v1487_v1 = vpop.f32.mrf.mxu1 }
 0x10f   : > { %v1664_v0 = vadd.f32 %v1663_v61, %v1574_v56  ;;  %v1488_v34 = vadd.f32 %v1487_v1, %v1398_v62  ;;  %v4527_v56 = vor.u32 %v3879_v50, %v3445_v49  ;;  %v4529_v62 = vor.u32 %v3878_v51, %v3447_v54 }
 0x111   : > { %v3038_v4 = vpack.c.bf16 %v1664_v0, %v1486_v55 }
 0x113   : > { %3134 = vst [vmem:[%s4454_s19 + $0xc0] sm:$0xff] %v3038_v4 }
 0x115   : > { %v1576_v20 = vpop.f32.mrf.mxu2  ;;  %v1401_v30 = vpop.f32.mrf.mxu0 }
 0x116   : > { %v1665_v28 = vpop.f32.mrf.mxu3  ;;  %v1490_v36 = vpop.f32.mrf.mxu1 }
 0x117   : > { %v1666_v35 = vadd.f32 %v1665_v28, %v1576_v20  ;;  %v1491_v39 = vadd.f32 %v1490_v36, %v1401_v30  ;;  %v3881_v36 = vld [vmem:[%s4331_s15 + $0xf4] sm:$0xf0] }
 0x118   : > { %1440 = vmatmul.bf16.gmra.mxu0 %v4513_v21 }
 0x119   : > { %v3041_v37 = vpack.c.bf16 %v1666_v35, %v1488_v34  ;;  %1529 = vmatmul.bf16.gmra.mxu1 %v4515_v31  ;;  %v3453_v35 = vld [vmem:[%s4331_s15 + $0xf0] sm:$0xf] }
 0x11a   : > { %1618 = vmatmul.bf16.gmra.mxu2 %v4513_v21  ;;  %v4541_v49 = vor.u32 %v3881_v36, %v3453_v35  ;;  %v3623_v35 = vld [vmem:[#allocation6 + $0x148] sm:$0xf0] }
 0x11b   : > { %3137 = vst [vmem:[%s4454_s19 + $0xd8] sm:$0xff] %v3041_v37  ;;  %1707 = vmatmul.bf16.gmra.mxu3 %v4515_v31  ;;  %v3880_v37 = vld [vmem:[%s4331_s15 + $0xf4] sm:$0xf] }
 0x11d   : > { %v1579_v40 = vpop.f32.mrf.mxu2  ;;  %v1403_v44 = vpop.f32.mrf.mxu0 }
 0x11e   : > { %v1668_v42 = vpop.f32.mrf.mxu3  ;;  %v1492_v46 = vpop.f32.mrf.mxu1 }
 0x11f   : > { %v1669_v45 = vadd.f32 %v1668_v42, %v1579_v40  ;;  %v1493_v0 = vadd.f32 %v1492_v46, %v1403_v44  ;;  %v3645_v40 = vld [vmem:[#allocation6 + $0x160] sm:$0xf]  ;;  %v3929_v42 = vld [vmem:[#allocation6 + $0x174] sm:$0xf0] }
 0x120   : > { %v3646_v44 = vor.u32 %v3929_v42, %v3645_v40  ;;  %v3977_v46 = vld [vmem:[#allocation6 + $0x2f4] sm:$0xf0] }
 0x121   : > { %v3044_v48 = vpack.c.bf16 %v1669_v45, %v1491_v39  ;;  %v3455_v39 = vld [vmem:[%s4331_s15 + $0xf8] sm:$0xf0]  ;;  %v3837_v45 = vld [vmem:[#allocation6 + $0x2e0] sm:$0xf] }
 0x122   : > { %v3838_v50 = vor.u32 %v3977_v46, %v3837_v45  ;;  %2079 = vmatpush.bf16.msra.mxu0 %v3646_v44 }
 0x123   : > { %3140 = vst [vmem:[%s4454_s19 + $0xf0] sm:$0xff] %v3044_v48 }
 0x124   : > { %2168 = vmatpush.bf16.msra.mxu1 %v3838_v50 }
 0x125   : > { %v1581_v55 = vpop.f32.mrf.mxu2  ;;  %v1406_v61 = vpop.f32.mrf.mxu0 }
 0x126   : > { %v1670_v60 = vpop.f32.mrf.mxu3  ;;  %v1495_v4 = vpop.f32.mrf.mxu1 }
 0x127   : > { %v1671_v1 = vadd.f32 %v1670_v60, %v1581_v55  ;;  %v1496_v16 = vadd.f32 %v1495_v4, %v1406_v61  ;;  %v4543_v55 = vor.u32 %v3880_v37, %v3455_v39  ;;  %v3968_v37 = vld [vmem:[#allocation6 + $0x2b4] sm:$0xf]  ;;  %v3815_v39 = vld [vmem:[#allocation6 + $0x2c8] sm:$0xf0] }
 0x128   : > { %1445 = vmatmul.bf16.gmra.mxu0 %v4527_v56  ;;  %v3818_v44 = vor.u32 %v3968_v37, %v3815_v39 }
 0x129   : > { %v3047_v6 = vpack.c.bf16 %v1671_v1, %v1493_v0  ;;  %1534 = vmatmul.bf16.gmra.mxu1 %v4529_v62 }
 0x12a   : > { %1623 = vmatmul.bf16.gmra.mxu2 %v4527_v56  ;;  %2347 = vmatpush.bf16.msra.mxu3 %v3818_v44 }
 0x12b   : > { %3143 = vst [vmem:[%s4454_s19 + $0x108] sm:$0xff] %v3047_v6  ;;  %1712 = vmatmul.bf16.gmra.mxu3 %v4529_v62 }
 0x12d   : > { %v1584_v18 = vpop.f32.mrf.mxu2  ;;  %v1408_v25 = vpop.f32.mrf.mxu0 }
 0x12e   : > { %v1673_v20 = vpop.f32.mrf.mxu3  ;;  %v1497_v30 = vpop.f32.mrf.mxu1 }
 0x12f   : > { %v1674_v28 = vadd.f32 %v1673_v20, %v1584_v18  ;;  %v1498_v60 = vadd.f32 %v1497_v30, %v1408_v25 }
 0x131   : > { %v3050_v34 = vpack.c.bf16 %v1674_v28, %v1496_v16 }
 0x133   : > { %3146 = vst [vmem:[%s4454_s19 + $0x120] sm:$0xff] %v3050_v34  ;;  %v3920_v34 = vld [vmem:[#allocation6 + $0x134] sm:$0xf] }
 0x134   : > { %v3626_v36 = vor.u32 %v3920_v34, %v3623_v35 }
 0x135   : > { %v1586_v48 = vpop.f32.mrf.mxu2  ;;  %v1411_v54 = vpop.f32.mrf.mxu0 }
 0x136   : > { %v1675_v51 = vpop.f32.mrf.mxu3  ;;  %v1500_v0 = vpop.f32.mrf.mxu1  ;;  %2258 = vmatpush.bf16.msra.mxu2 %v3626_v36 }
 0x137   : > { %v1676_v61 = vadd.f32 %v1675_v51, %v1586_v48  ;;  %v1501_v4 = vadd.f32 %v1500_v0, %v1411_v54  ;;  %v3621_v54 = vld [vmem:[#allocation6 + $0x130] sm:$0xf] }
 0x138   : > { %1450 = vmatmul.bf16.gmra.mxu0 %v4541_v49  ;;  %v3813_v0 = vld [vmem:[#allocation6 + $0x2b0] sm:$0xf] }
 0x139   : > { %v3053_v1 = vpack.c.bf16 %v1676_v61, %v1498_v60  ;;  %1539 = vmatmul.bf16.gmra.mxu1 %v4543_v55  ;;  %v3923_v60 = vld [vmem:[#allocation6 + $0x144] sm:$0xf0] }
 0x13a   : > { %1628 = vmatmul.bf16.gmra.mxu2 %v4541_v49  ;;  %v3622_v61 = vor.u32 %v3923_v60, %v3621_v54 }
 0x13b   : > { %3149 = vst [vmem:[%s4454_s19 + $0x138] sm:$0xff] %v3053_v1  ;;  %1717 = vmatmul.bf16.gmra.mxu3 %v4543_v55  ;;  %v3971_v1 = vld [vmem:[#allocation6 + $0x2c4] sm:$0xf0] }
 0x13c   : > { %2080 = vmatpush.bf16.msra.mxu0 %v3622_v61 }
 0x13d   : > { %v1589_v6 = vpop.f32.mrf.mxu2  ;;  %v1413_v10 = vpop.f32.mrf.mxu0 }
 0x13e   : > { %v1678_v7 = vpop.f32.mrf.mxu3  ;;  %v1502_v13 = vpop.f32.mrf.mxu1 }
 0x13f   : > { %v1679_v12 = vadd.f32 %v1678_v7, %v1589_v6  ;;  %v1503_v20 = vadd.f32 %v1502_v13, %v1413_v10  ;;  %v3814_v6 = vor.u32 %v3971_v1, %v3813_v0 }
 0x141   : > { %v3056_v14 = vpack.c.bf16 %v1679_v12, %v1501_v4  ;;  %2169 = vmatpush.bf16.msra.mxu1 %v3814_v6 }
 0x143   : > { %3152 = vst [vmem:[%s4454_s19 + $0x150] sm:$0xff] %v3056_v14 }
 0x145   : > { %v1591_v16 = vpop.f32.mrf.mxu2  ;;  %v1416_v19 = vpop.f32.mrf.mxu0 }
 0x146   : > { %v1680_v18 = vpop.f32.mrf.mxu3  ;;  %v1505_v28 = vpop.f32.mrf.mxu1 }
 0x147   : > { %v1681_v25 = vadd.f32 %v1680_v18, %v1591_v16  ;;  %v1506_v40 = vadd.f32 %v1505_v28, %v1416_v19 }
 0x148   : > { %1731 = vmatmul.bf16.vlgmr.msrb.gmra.mxu0 %v4345_v43 }
 0x149   : > { %v3059_v30 = vpack.c.bf16 %v1681_v25, %v1503_v20  ;;  %1820 = vmatmul.bf16.vlgmr.msrb.gmra.mxu1 %v4347_v47 }
 0x14a   : > { %1909 = vmatmul.bf16.vlgmr.msrb.gmra.mxu2 %v4345_v43 }
 0x14b   : > { %3155 = vst [vmem:[%s4454_s19 + $0x168] sm:$0xff] %v3059_v30  ;;  %1998 = vmatmul.bf16.vlgmr.msrb.gmra.mxu3 %v4347_v47 }
 0x14d   : > { %v1594_v42 = vpop.f32.mrf.mxu2  ;;  %v1418_v46 = vpop.f32.mrf.mxu0 }
 0x14e   : > { %v1683_v45 = vpop.f32.mrf.mxu3  ;;  %v1507_v50 = vpop.f32.mrf.mxu1 }
 0x14f   : > { %v1684_v48 = vadd.f32 %v1683_v45, %v1594_v42  ;;  %v1508_v12 = vadd.f32 %v1507_v50, %v1418_v46  ;;  %v3914_v45 = vld [vmem:[#allocation6 + $0x104] sm:$0xf]  ;;  %v3599_v46 = vld [vmem:[#allocation6 + $0x118] sm:$0xf0] }
 0x150   : > { %v3962_v50 = vld [vmem:[#allocation6 + $0x284] sm:$0xf] }
 0x151   : > { %v3062_v51 = vpack.c.bf16 %v1684_v48, %v1506_v40  ;;  %v3602_v48 = vor.u32 %v3914_v45, %v3599_v46 }
 0x153   : > { %3158 = vst [vmem:[%s4454_s19 + $0x180] sm:$0xff] %v3062_v51  ;;  %v3791_v51 = vld [vmem:[#allocation6 + $0x298] sm:$0xf0]  ;;  %2259 = vmatpush.bf16.msra.mxu2 %v3602_v48 }
 0x154   : > { %v3794_v61 = vor.u32 %v3962_v50, %v3791_v51 }
 0x155   : > { %v1596_v4 = vpop.f32.mrf.mxu2  ;;  %v1421_v10 = vpop.f32.mrf.mxu0 }
 0x156   : > { %v1685_v7 = vpop.f32.mrf.mxu3  ;;  %v1510_v14 = vpop.f32.mrf.mxu1  ;;  %2348 = vmatpush.bf16.msra.mxu3 %v3794_v61 }
 0x157   : > { %v1686_v13 = vadd.f32 %v1685_v7, %v1596_v4  ;;  %v1511_v18 = vadd.f32 %v1510_v14, %v1421_v10  ;;  %v3597_v10 = vld [vmem:[#allocation6 + $0x100] sm:$0xf] }
 0x158   : > { %1736 = vmatmul.bf16.gmra.mxu0 %v4357_v2  ;;  %v3789_v14 = vld [vmem:[#allocation6 + $0x280] sm:$0xf] }
 0x159   : > { %v3065_v16 = vpack.c.bf16 %v1686_v13, %v1508_v12  ;;  %1825 = vmatmul.bf16.gmra.mxu1 %v4359_v3  ;;  %v3917_v12 = vld [vmem:[#allocation6 + $0x114] sm:$0xf0] }
 0x15a   : > { %1914 = vmatmul.bf16.gmra.mxu2 %v4357_v2  ;;  %v3598_v13 = vor.u32 %v3917_v12, %v3597_v10 }
 0x15b   : > { %3161 = vst [vmem:[%s4454_s19 + $0x198] sm:$0xff] %v3065_v16  ;;  %2003 = vmatmul.bf16.gmra.mxu3 %v4359_v3  ;;  %v3965_v16 = vld [vmem:[#allocation6 + $0x294] sm:$0xf0] }
 0x15c   : > { %2081 = vmatpush.bf16.msra.mxu0 %v3598_v13 }
 0x15d   : > { %v1599_v19 = vpop.f32.mrf.mxu2  ;;  %v1423_v25 = vpop.f32.mrf.mxu0 }
 0x15e   : > { %v1688_v20 = vpop.f32.mrf.mxu3  ;;  %v1512_v30 = vpop.f32.mrf.mxu1 }
 0x15f   : > { %v1689_v28 = vadd.f32 %v1688_v20, %v1599_v19  ;;  %v1513_v39 = vadd.f32 %v1512_v30, %v1423_v25  ;;  %v3790_v19 = vor.u32 %v3965_v16, %v3789_v14 }
 0x161   : > { %v3068_v34 = vpack.c.bf16 %v1689_v28, %v1511_v18  ;;  %2170 = vmatpush.bf16.msra.mxu1 %v3790_v19 }
 0x163   : > { %3164 = vst [vmem:[%s4454_s19 + $0x1b0] sm:$0xff] %v3068_v34 }
 0x165   : > { %v1601_v35 = vpop.f32.mrf.mxu2  ;;  %v1426_v37 = vpop.f32.mrf.mxu0 }
 0x166   : > { %v1690_v36 = vpop.f32.mrf.mxu3  ;;  %v1515_v42 = vpop.f32.mrf.mxu1 }
 0x167   : > { %v1691_v40 = vadd.f32 %v1690_v36, %v1601_v35  ;;  %v1516_v54 = vadd.f32 %v1515_v42, %v1426_v37 }
 0x168   : > { %1741 = vmatmul.bf16.gmra.mxu0 %v4369_v8 }
 0x169   : > { %v3071_v44 = vpack.c.bf16 %v1691_v40, %v1513_v39  ;;  %1830 = vmatmul.bf16.gmra.mxu1 %v4371_v9 }
 0x16a   : > { %1919 = vmatmul.bf16.gmra.mxu2 %v4369_v8 }
 0x16b   : > { %3167 = vst [vmem:[%s4454_s19 + $0x1c8] sm:$0xff] %v3071_v44  ;;  %2008 = vmatmul.bf16.gmra.mxu3 %v4371_v9 }
 0x16d   : > { %v1604_v60 = vpop.f32.mrf.mxu2  ;;  %v1428_v1 = vpop.f32.mrf.mxu0 }
 0x16e   : > { %v1693_v0 = vpop.f32.mrf.mxu3  ;;  %v1517_v6 = vpop.f32.mrf.mxu1 }
 0x16f   : > { %v1694_v4 = vadd.f32 %v1693_v0, %v1604_v60  ;;  %v1518_v28 = vadd.f32 %v1517_v6, %v1428_v1  ;;  %v3908_v0 = vld [vmem:[#allocation6 + $0xd4] sm:$0xf]  ;;  %v3575_v1 = vld [vmem:[#allocation6 + $0xe8] sm:$0xf0] }
 0x170   : > { %v3956_v6 = vld [vmem:[#allocation6 + $0x254] sm:$0xf] }
 0x171   : > { %v3074_v7 = vpack.c.bf16 %v1694_v4, %v1516_v54  ;;  %v3578_v4 = vor.u32 %v3908_v0, %v3575_v1 }
 0x173   : > { %3170 = vst [vmem:[%s4454_s19 + $0x1e0] sm:$0xff] %v3074_v7  ;;  %v3767_v7 = vld [vmem:[#allocation6 + $0x268] sm:$0xf0]  ;;  %2260 = vmatpush.bf16.msra.mxu2 %v3578_v4 }
 0x174   : > { %v3770_v13 = vor.u32 %v3956_v6, %v3767_v7 }
 0x175   : > { %v1606_v18 = vpop.f32.mrf.mxu2  ;;  %v1431_v25 = vpop.f32.mrf.mxu0 }
 0x176   : > { %v1695_v20 = vpop.f32.mrf.mxu3  ;;  %v1520_v34 = vpop.f32.mrf.mxu1  ;;  %2349 = vmatpush.bf16.msra.mxu3 %v3770_v13 }
 0x177   : > { %v1696_v30 = vadd.f32 %v1695_v20, %v1606_v18  ;;  %v1521_v36 = vadd.f32 %v1520_v34, %v1431_v25  ;;  %v3573_v25 = vld [vmem:[#allocation6 + $0xd0] sm:$0xf] }
 0x178   : > { %1746 = vmatmul.bf16.gmra.mxu0 %v4381_v26  ;;  %v3765_v34 = vld [vmem:[#allocation6 + $0x250] sm:$0xf] }
 0x179   : > { %v3077_v35 = vpack.c.bf16 %v1696_v30, %v1518_v28  ;;  %1835 = vmatmul.bf16.gmra.mxu1 %v4383_v27  ;;  %v3911_v28 = vld [vmem:[#allocation6 + $0xe4] sm:$0xf0] }
 0x17a   : > { %1924 = vmatmul.bf16.gmra.mxu2 %v4381_v26  ;;  %v3574_v30 = vor.u32 %v3911_v28, %v3573_v25 }
 0x17b   : > { %3173 = vst [vmem:[%s4454_s19 + $0x1f8] sm:$0xff] %v3077_v35  ;;  %2013 = vmatmul.bf16.gmra.mxu3 %v4383_v27  ;;  %v3959_v35 = vld [vmem:[#allocation6 + $0x264] sm:$0xf0] }
 0x17c   : > { %2082 = vmatpush.bf16.msra.mxu0 %v3574_v30 }
 0x17d   : > { %v1609_v37 = vpop.f32.mrf.mxu2  ;;  %v1433_v40 = vpop.f32.mrf.mxu0 }
 0x17e   : > { %v1698_v39 = vpop.f32.mrf.mxu3  ;;  %v1522_v44 = vpop.f32.mrf.mxu1 }
 0x17f   : > { %v1699_v42 = vadd.f32 %v1698_v39, %v1609_v37  ;;  %v1523_v51 = vadd.f32 %v1522_v44, %v1433_v40  ;;  %v3766_v37 = vor.u32 %v3959_v35, %v3765_v34 }
 0x181   : > { %v3080_v45 = vpack.c.bf16 %v1699_v42, %v1521_v36  ;;  %2171 = vmatpush.bf16.msra.mxu1 %v3766_v37 }
 0x183   : > { %3176 = vst [vmem:[%s4454_s19 + $0x210] sm:$0xff] %v3080_v45 }
 0x185   : > { %v1611_v46 = vpop.f32.mrf.mxu2  ;;  %v1436_v50 = vpop.f32.mrf.mxu0 }
 0x186   : > { %v1700_v48 = vpop.f32.mrf.mxu3  ;;  %v1525_v60 = vpop.f32.mrf.mxu1 }
 0x187   : > { %v1701_v54 = vadd.f32 %v1700_v48, %v1611_v46  ;;  %v1526_v10 = vadd.f32 %v1525_v60, %v1436_v50 }
 0x188   : > { %1751 = vmatmul.bf16.gmra.mxu0 %v4393_v32 }
 0x189   : > { %v3083_v61 = vpack.c.bf16 %v1701_v54, %v1523_v51  ;;  %1840 = vmatmul.bf16.gmra.mxu1 %v4395_v33 }
 0x18a   : > { %1929 = vmatmul.bf16.gmra.mxu2 %v4393_v32 }
 0x18b   : > { %3179 = vst [vmem:[%s4454_s19 + $0x228] sm:$0xff] %v3083_v61  ;;  %2018 = vmatmul.bf16.gmra.mxu3 %v4395_v33 }
 0x18d   : > { %v1614_v12 = vpop.f32.mrf.mxu2  ;;  %v1438_v16 = vpop.f32.mrf.mxu0 }
 0x18e   : > { %v1703_v14 = vpop.f32.mrf.mxu3  ;;  %v1527_v19 = vpop.f32.mrf.mxu1 }
 0x18f   : > { %v1704_v18 = vadd.f32 %v1703_v14, %v1614_v12  ;;  %v1528_v42 = vadd.f32 %v1527_v19, %v1438_v16  ;;  %v3902_v14 = vld [vmem:[#allocation6 + $0xa4] sm:$0xf]  ;;  %v3551_v16 = vld [vmem:[#allocation6 + $0xb8] sm:$0xf0] }
 0x190   : > { %v3950_v19 = vld [vmem:[#allocation6 + $0x224] sm:$0xf] }
 0x191   : > { %v3086_v20 = vpack.c.bf16 %v1704_v18, %v1526_v10  ;;  %v3554_v18 = vor.u32 %v3902_v14, %v3551_v16 }
 0x193   : > { %3182 = vst [vmem:[%s4454_s19 + $0x240] sm:$0xff] %v3086_v20  ;;  %v3743_v20 = vld [vmem:[#allocation6 + $0x238] sm:$0xf0]  ;;  %2261 = vmatpush.bf16.msra.mxu2 %v3554_v18 }
 0x194   : > { %v3746_v30 = vor.u32 %v3950_v19, %v3743_v20 }
 0x195   : > { %v1616_v36 = vpop.f32.mrf.mxu2  ;;  %v1441_v40 = vpop.f32.mrf.mxu0 }
 0x196   : > { %v1705_v39 = vpop.f32.mrf.mxu3  ;;  %v1530_v45 = vpop.f32.mrf.mxu1  ;;  %2350 = vmatpush.bf16.msra.mxu3 %v3746_v30 }
 0x197   : > { %v1706_v44 = vadd.f32 %v1705_v39, %v1616_v36  ;;  %v1531_v48 = vadd.f32 %v1530_v45, %v1441_v40  ;;  %v3549_v40 = vld [vmem:[#allocation6 + $0xa0] sm:$0xf] }
 0x198   : > { %1756 = vmatmul.bf16.gmra.mxu0 %v4405_v52  ;;  %v3741_v45 = vld [vmem:[#allocation6 + $0x220] sm:$0xf] }
 0x199   : > { %v3089_v46 = vpack.c.bf16 %v1706_v44, %v1528_v42  ;;  %1845 = vmatmul.bf16.gmra.mxu1 %v4407_v53  ;;  %v3905_v42 = vld [vmem:[#allocation6 + $0xb4] sm:$0xf0] }
 0x19a   : > { %1934 = vmatmul.bf16.gmra.mxu2 %v4405_v52  ;;  %v3550_v44 = vor.u32 %v3905_v42, %v3549_v40 }
 0x19b   : > { %3185 = vst [vmem:[%s4454_s19 + $0x258] sm:$0xff] %v3089_v46  ;;  %2023 = vmatmul.bf16.gmra.mxu3 %v4407_v53  ;;  %v3953_v46 = vld [vmem:[#allocation6 + $0x234] sm:$0xf0] }
 0x19c   : > { %2083 = vmatpush.bf16.msra.mxu0 %v3550_v44 }
 0x19d   : > { %v1619_v50 = vpop.f32.mrf.mxu2  ;;  %v1443_v54 = vpop.f32.mrf.mxu0 }
 0x19e   : > { %v1708_v51 = vpop.f32.mrf.mxu3  ;;  %v1532_v61 = vpop.f32.mrf.mxu1 }
 0x19f   : > { %v1709_v60 = vadd.f32 %v1708_v51, %v1619_v50  ;;  %v1533_v7 = vadd.f32 %v1532_v61, %v1443_v54  ;;  %v3742_v50 = vor.u32 %v3953_v46, %v3741_v45 }
 0x1a1   : > { %v3092_v0 = vpack.c.bf16 %v1709_v60, %v1531_v48  ;;  %2172 = vmatpush.bf16.msra.mxu1 %v3742_v50 }
 0x1a3   : > { %3188 = vst [vmem:[%s4454_s19 + $0x270] sm:$0xff] %v3092_v0 }
 0x1a5   : > { %v1621_v1 = vpop.f32.mrf.mxu2  ;;  %v1446_v6 = vpop.f32.mrf.mxu0 }
 0x1a6   : > { %v1710_v4 = vpop.f32.mrf.mxu3  ;;  %v1535_v12 = vpop.f32.mrf.mxu1 }
 0x1a7   : > { %v1711_v10 = vadd.f32 %v1710_v4, %v1621_v1  ;;  %v1536_v25 = vadd.f32 %v1535_v12, %v1446_v6 }
 0x1a8   : > { %1761 = vmatmul.bf16.gmra.mxu0 %v4417_v58 }
 0x1a9   : > { %v3095_v13 = vpack.c.bf16 %v1711_v10, %v1533_v7  ;;  %1850 = vmatmul.bf16.gmra.mxu1 %v4419_v59 }
 0x1aa   : > { %1939 = vmatmul.bf16.gmra.mxu2 %v4417_v58 }
 0x1ab   : > { %3191 = vst [vmem:[%s4454_s19 + $0x288] sm:$0xff] %v3095_v13  ;;  %2028 = vmatmul.bf16.gmra.mxu3 %v4419_v59 }
 0x1ad   : > { %v1624_v28 = vpop.f32.mrf.mxu2  ;;  %v1448_v35 = vpop.f32.mrf.mxu0 }
 0x1ae   : > { %v1713_v34 = vpop.f32.mrf.mxu3  ;;  %v1537_v37 = vpop.f32.mrf.mxu1 }
 0x1af   : > { %v1714_v36 = vadd.f32 %v1713_v34, %v1624_v28  ;;  %v1538_v60 = vadd.f32 %v1537_v37, %v1448_v35  ;;  %v3896_v34 = vld [vmem:[#allocation6 + $0x74] sm:$0xf]  ;;  %v3527_v35 = vld [vmem:[#allocation6 + $0x88] sm:$0xf0] }
 0x1b0   : > { %v3944_v37 = vld [vmem:[#allocation6 + $0x1f4] sm:$0xf] }
 0x1b1   : > { %v3098_v39 = vpack.c.bf16 %v1714_v36, %v1536_v25  ;;  %v3530_v36 = vor.u32 %v3896_v34, %v3527_v35 }
 0x1b3   : > { %3194 = vst [vmem:[%s4454_s19 + $0x2a0] sm:$0xff] %v3098_v39  ;;  %v3719_v39 = vld [vmem:[#allocation6 + $0x208] sm:$0xf0]  ;;  %2262 = vmatpush.bf16.msra.mxu2 %v3530_v36 }
 0x1b4   : > { %v3722_v44 = vor.u32 %v3944_v37, %v3719_v39 }
 0x1b5   : > { %v1626_v48 = vpop.f32.mrf.mxu2  ;;  %v1451_v54 = vpop.f32.mrf.mxu0 }
 0x1b6   : > { %v1715_v51 = vpop.f32.mrf.mxu3  ;;  %v1540_v0 = vpop.f32.mrf.mxu1  ;;  %2351 = vmatpush.bf16.msra.mxu3 %v3722_v44 }
 0x1b7   : > { %v1716_v61 = vadd.f32 %v1715_v51, %v1626_v48  ;;  %v1541_v4 = vadd.f32 %v1540_v0, %v1451_v54  ;;  %v3525_v54 = vld [vmem:[#allocation6 + $0x70] sm:$0xf] }
 0x1b8   : > { %1766 = vmatmul.bf16.gmra.mxu0 %v4429_v15  ;;  %v3717_v0 = vld [vmem:[#allocation6 + $0x1f0] sm:$0xf] }
 0x1b9   : > { %v3101_v1 = vpack.c.bf16 %v1716_v61, %v1538_v60  ;;  %1855 = vmatmul.bf16.gmra.mxu1 %v4431_v17  ;;  %v3899_v60 = vld [vmem:[#allocation6 + $0x84] sm:$0xf0] }
 0x1ba   : > { %1944 = vmatmul.bf16.gmra.mxu2 %v4429_v15  ;;  %v3526_v61 = vor.u32 %v3899_v60, %v3525_v54 }
 0x1bb   : > { %3197 = vst [vmem:[%s4454_s19 + $0x2b8] sm:$0xff] %v3101_v1  ;;  %2033 = vmatmul.bf16.gmra.mxu3 %v4431_v17  ;;  %v3947_v1 = vld [vmem:[#allocation6 + $0x204] sm:$0xf0] }
 0x1bc   : > { %2084 = vmatpush.bf16.msra.mxu0 %v3526_v61 }
 0x1bd   : > { %v1629_v6 = vpop.f32.mrf.mxu2  ;;  %v1453_v10 = vpop.f32.mrf.mxu0 }
 0x1be   : > { %v1718_v7 = vpop.f32.mrf.mxu3  ;;  %v1542_v13 = vpop.f32.mrf.mxu1 }
 0x1bf   : > { %v1719_v12 = vadd.f32 %v1718_v7, %v1629_v6  ;;  %v1543_v20 = vadd.f32 %v1542_v13, %v1453_v10  ;;  %v3718_v6 = vor.u32 %v3947_v1, %v3717_v0 }
 0x1c1   : > { %v3104_v14 = vpack.c.bf16 %v1719_v12, %v1541_v4  ;;  %2173 = vmatpush.bf16.msra.mxu1 %v3718_v6 }
 0x1c3   : > { %3200 = vst [vmem:[%s4454_s19 + $0x2d0] sm:$0xff] %v3104_v14 }
 0x1c5   : > { %v1631_v16 = vpop.f32.mrf.mxu2  ;;  %v1732_v19 = vpop.f32.mrf.mxu0 }
 0x1c6   : > { %v1720_v18 = vpop.f32.mrf.mxu3  ;;  %v1821_v28 = vpop.f32.mrf.mxu1 }
 0x1c7   : > { %v1721_v25 = vadd.f32 %v1720_v18, %v1631_v16  ;;  %v1822_v40 = vadd.f32 %v1821_v28, %v1732_v19 }
 0x1c8   : > { %1771 = vmatmul.bf16.gmra.mxu0 %v4441_v22 }
 0x1c9   : > { %v3107_v30 = vpack.c.bf16 %v1721_v25, %v1543_v20  ;;  %1860 = vmatmul.bf16.gmra.mxu1 %v4443_v24 }
 0x1ca   : > { %1949 = vmatmul.bf16.gmra.mxu2 %v4441_v22 }
 0x1cb   : > { %3203 = vst [vmem:[%s4454_s19 + $0x2e8] sm:$0xff] %v3107_v30  ;;  %2038 = vmatmul.bf16.gmra.mxu3 %v4443_v24 }
 0x1cd   : > { %v1910_v42 = vpop.f32.mrf.mxu2  ;;  %v1734_v46 = vpop.f32.mrf.mxu0 }
 0x1ce   : > { %v1999_v45 = vpop.f32.mrf.mxu3  ;;  %v1823_v50 = vpop.f32.mrf.mxu1 }
 0x1cf   : > { %v2000_v48 = vadd.f32 %v1999_v45, %v1910_v42  ;;  %v1824_v12 = vadd.f32 %v1823_v50, %v1734_v46  ;;  %v3890_v45 = vld [vmem:[#allocation6 + $0x44] sm:$0xf]  ;;  %v3503_v46 = vld [vmem:[#allocation6 + $0x58] sm:$0xf0] }
 0x1d0   : > { %v3938_v50 = vld [vmem:[#allocation6 + $0x1c4] sm:$0xf] }
 0x1d1   : > { %v3015_v51 = vpack.c.bf16 %v2000_v48, %v1822_v40  ;;  %v3506_v48 = vor.u32 %v3890_v45, %v3503_v46 }
 0x1d3   : > { %3111 = vst [vmem:[%s4454_s19 + $0x8] sm:$0xff] %v3015_v51  ;;  %v3695_v51 = vld [vmem:[#allocation6 + $0x1d8] sm:$0xf0]  ;;  %2263 = vmatpush.bf16.msra.mxu2 %v3506_v48 }
 0x1d4   : > { %v3698_v61 = vor.u32 %v3938_v50, %v3695_v51 }
 0x1d5   : > { %v1912_v4 = vpop.f32.mrf.mxu2  ;;  %v1737_v10 = vpop.f32.mrf.mxu0 }
 0x1d6   : > { %v2001_v7 = vpop.f32.mrf.mxu3  ;;  %v1826_v14 = vpop.f32.mrf.mxu1  ;;  %2352 = vmatpush.bf16.msra.mxu3 %v3698_v61 }
 0x1d7   : > { %v2002_v13 = vadd.f32 %v2001_v7, %v1912_v4  ;;  %v1827_v18 = vadd.f32 %v1826_v14, %v1737_v10  ;;  %v3501_v10 = vld [vmem:[#allocation6 + $0x40] sm:$0xf] }
 0x1d8   : > { %1776 = vmatmul.bf16.gmra.mxu0 %v4457_v57  ;;  %v3693_v14 = vld [vmem:[#allocation6 + $0x1c0] sm:$0xf] }
 0x1d9   : > { %v3018_v16 = vpack.c.bf16 %v2002_v13, %v1824_v12  ;;  %1865 = vmatmul.bf16.gmra.mxu1 %v4459_v63  ;;  %v3893_v12 = vld [vmem:[#allocation6 + $0x54] sm:$0xf0] }
 0x1da   : > { %1954 = vmatmul.bf16.gmra.mxu2 %v4457_v57  ;;  %v3502_v13 = vor.u32 %v3893_v12, %v3501_v10 }
 0x1db   : > { %3114 = vst [vmem:[%s4454_s19 + $0x20] sm:$0xff] %v3018_v16  ;;  %2043 = vmatmul.bf16.gmra.mxu3 %v4459_v63  ;;  %v3941_v16 = vld [vmem:[#allocation6 + $0x1d4] sm:$0xf0] }
 0x1dc   : > { %2085 = vmatpush.bf16.msra.mxu0 %v3502_v13 }
 0x1dd   : > { %v1915_v19 = vpop.f32.mrf.mxu2  ;;  %v1739_v25 = vpop.f32.mrf.mxu0 }
 0x1de   : > { %v2004_v20 = vpop.f32.mrf.mxu3  ;;  %v1828_v30 = vpop.f32.mrf.mxu1 }
 0x1df   : > { %v2005_v28 = vadd.f32 %v2004_v20, %v1915_v19  ;;  %v1829_v39 = vadd.f32 %v1828_v30, %v1739_v25  ;;  %v3694_v19 = vor.u32 %v3941_v16, %v3693_v14 }
 0x1e1   : > { %v3021_v34 = vpack.c.bf16 %v2005_v28, %v1827_v18  ;;  %2174 = vmatpush.bf16.msra.mxu1 %v3694_v19 }
 0x1e3   : > { %3117 = vst [vmem:[%s4454_s19 + $0x38] sm:$0xff] %v3021_v34 }
 0x1e5   : > { %v1917_v35 = vpop.f32.mrf.mxu2  ;;  %v1742_v37 = vpop.f32.mrf.mxu0 }
 0x1e6   : > { %v2006_v36 = vpop.f32.mrf.mxu3  ;;  %v1831_v42 = vpop.f32.mrf.mxu1 }
 0x1e7   : > { %v2007_v40 = vadd.f32 %v2006_v36, %v1917_v35  ;;  %v1832_v54 = vadd.f32 %v1831_v42, %v1742_v37 }
 0x1e8   : > { %1781 = vmatmul.bf16.gmra.mxu0 %v4471_v23 }
 0x1e9   : > { %v3024_v44 = vpack.c.bf16 %v2007_v40, %v1829_v39  ;;  %1870 = vmatmul.bf16.gmra.mxu1 %v4473_v29 }
 0x1ea   : > { %1959 = vmatmul.bf16.gmra.mxu2 %v4471_v23 }
 0x1eb   : > { %3120 = vst [vmem:[%s4454_s19 + $0x50] sm:$0xff] %v3024_v44  ;;  %2048 = vmatmul.bf16.gmra.mxu3 %v4473_v29 }
 0x1ed   : > { %v1920_v60 = vpop.f32.mrf.mxu2  ;;  %v1744_v1 = vpop.f32.mrf.mxu0 }
 0x1ee   : > { %v2009_v0 = vpop.f32.mrf.mxu3  ;;  %v1833_v6 = vpop.f32.mrf.mxu1 }
 0x1ef   : > { %v2010_v4 = vadd.f32 %v2009_v0, %v1920_v60  ;;  %v1834_v28 = vadd.f32 %v1833_v6, %v1744_v1  ;;  %v3884_v0 = vld [vmem:[#allocation6 + $0x14] sm:$0xf]  ;;  %v3479_v1 = vld [vmem:[#allocation6 + $0x28] sm:$0xf0] }
 0x1f0   : > { %v3932_v6 = vld [vmem:[#allocation6 + $0x194] sm:$0xf] }
 0x1f1   : > { %v3027_v7 = vpack.c.bf16 %v2010_v4, %v1832_v54  ;;  %v3482_v4 = vor.u32 %v3884_v0, %v3479_v1 }
 0x1f3   : > { %3123 = vst [vmem:[%s4454_s19 + $0x68] sm:$0xff] %v3027_v7  ;;  %v3671_v7 = vld [vmem:[#allocation6 + $0x1a8] sm:$0xf0]  ;;  %2264 = vmatpush.bf16.msra.mxu2 %v3482_v4 }
 0x1f4   : > { %v3674_v13 = vor.u32 %v3932_v6, %v3671_v7 }
 0x1f5   : > { %v1922_v18 = vpop.f32.mrf.mxu2  ;;  %v1747_v25 = vpop.f32.mrf.mxu0 }
 0x1f6   : > { %v2011_v20 = vpop.f32.mrf.mxu3  ;;  %v1836_v34 = vpop.f32.mrf.mxu1  ;;  %2353 = vmatpush.bf16.msra.mxu3 %v3674_v13 }
 0x1f7   : > { %v2012_v30 = vadd.f32 %v2011_v20, %v1922_v18  ;;  %v1837_v36 = vadd.f32 %v1836_v34, %v1747_v25  ;;  %v3477_v25 = vld [vmem:[#allocation6 + $0x10] sm:$0xf] }
 0x1f8   : > { %1786 = vmatmul.bf16.gmra.mxu0 %v4485_v5  ;;  %v3669_v34 = vld [vmem:[#allocation6 + $0x190] sm:$0xf] }
 0x1f9   : > { %v3030_v35 = vpack.c.bf16 %v2012_v30, %v1834_v28  ;;  %1875 = vmatmul.bf16.gmra.mxu1 %v4487_v11  ;;  %v3887_v28 = vld [vmem:[#allocation6 + $0x24] sm:$0xf0] }
 0x1fa   : > { %1964 = vmatmul.bf16.gmra.mxu2 %v4485_v5  ;;  %v3478_v30 = vor.u32 %v3887_v28, %v3477_v25 }
 0x1fb   : > { %3126 = vst [vmem:[%s4454_s19 + $0x80] sm:$0xff] %v3030_v35  ;;  %2053 = vmatmul.bf16.gmra.mxu3 %v4487_v11  ;;  %v3935_v35 = vld [vmem:[#allocation6 + $0x1a4] sm:$0xf0] }
 0x1fc   : > { %2086 = vmatpush.bf16.msra.mxu0 %v3478_v30 }
 0x1fd   : > { %v1925_v37 = vpop.f32.mrf.mxu2  ;;  %v1749_v40 = vpop.f32.mrf.mxu0 }
 0x1fe   : > { %v2014_v39 = vpop.f32.mrf.mxu3  ;;  %v1838_v44 = vpop.f32.mrf.mxu1 }
 0x1ff   : > { %v2015_v42 = vadd.f32 %v2014_v39, %v1925_v37  ;;  %v1839_v51 = vadd.f32 %v1838_v44, %v1749_v40  ;;  %v3670_v37 = vor.u32 %v3935_v35, %v3669_v34 }
 0x201   : > { %v3033_v45 = vpack.c.bf16 %v2015_v42, %v1837_v36  ;;  %2175 = vmatpush.bf16.msra.mxu1 %v3670_v37 }
 0x203   : > { %3129 = vst [vmem:[%s4454_s19 + $0x98] sm:$0xff] %v3033_v45 }
 0x205   : > { %v1927_v46 = vpop.f32.mrf.mxu2  ;;  %v1752_v50 = vpop.f32.mrf.mxu0 }
 0x206   : > { %v2016_v48 = vpop.f32.mrf.mxu3  ;;  %v1841_v60 = vpop.f32.mrf.mxu1 }
 0x207   : > { %v2017_v54 = vadd.f32 %v2016_v48, %v1927_v46  ;;  %v1842_v10 = vadd.f32 %v1841_v60, %v1752_v50 }
 0x208   : > { %1791 = vmatmul.bf16.gmra.mxu0 %v4499_v38 }
 0x209   : > { %v3036_v61 = vpack.c.bf16 %v2017_v54, %v1839_v51  ;;  %1880 = vmatmul.bf16.gmra.mxu1 %v4501_v41 }
 0x20a   : > { %1969 = vmatmul.bf16.gmra.mxu2 %v4499_v38 }
 0x20b   : > { %3132 = vst [vmem:[%s4454_s19 + $0xb0] sm:$0xff] %v3036_v61  ;;  %2058 = vmatmul.bf16.gmra.mxu3 %v4501_v41 }
 0x20d   : > { %v1930_v12 = vpop.f32.mrf.mxu2  ;;  %v1754_v16 = vpop.f32.mrf.mxu0 }
 0x20e   : > { %v2019_v14 = vpop.f32.mrf.mxu3  ;;  %v1843_v19 = vpop.f32.mrf.mxu1 }
 0x20f   : > { %v2020_v18 = vadd.f32 %v2019_v14, %v1930_v12  ;;  %v1844_v42 = vadd.f32 %v1843_v19, %v1754_v16 }
 0x211   : > { %v3039_v20 = vpack.c.bf16 %v2020_v18, %v1842_v10 }
 0x213   : > { %3135 = vst [vmem:[%s4454_s19 + $0xc8] sm:$0xff] %v3039_v20 }
 0x215   : > { %v1932_v36 = vpop.f32.mrf.mxu2  ;;  %v1757_v40 = vpop.f32.mrf.mxu0 }
 0x216   : > { %v2021_v39 = vpop.f32.mrf.mxu3  ;;  %v1846_v45 = vpop.f32.mrf.mxu1 }
 0x217   : > { %v2022_v44 = vadd.f32 %v2021_v39, %v1932_v36  ;;  %v1847_v48 = vadd.f32 %v1846_v45, %v1757_v40 }
 0x218   : > { %1796 = vmatmul.bf16.gmra.mxu0 %v4513_v21 }
 0x219   : > { %v3042_v46 = vpack.c.bf16 %v2022_v44, %v1844_v42  ;;  %1885 = vmatmul.bf16.gmra.mxu1 %v4515_v31 }
 0x21a   : > { %1974 = vmatmul.bf16.gmra.mxu2 %v4513_v21 }
 0x21b   : > { %3138 = vst [vmem:[%s4454_s19 + $0xe0] sm:$0xff] %v3042_v46  ;;  %2063 = vmatmul.bf16.gmra.mxu3 %v4515_v31 }
 0x21d   : > { %v1935_v50 = vpop.f32.mrf.mxu2  ;;  %v1759_v54 = vpop.f32.mrf.mxu0 }
 0x21e   : > { %v2024_v51 = vpop.f32.mrf.mxu3  ;;  %v1848_v61 = vpop.f32.mrf.mxu1 }
 0x21f   : > { %v2025_v60 = vadd.f32 %v2024_v51, %v1935_v50  ;;  %v1849_v7 = vadd.f32 %v1848_v61, %v1759_v54 }
 0x221   : > { %v3045_v0 = vpack.c.bf16 %v2025_v60, %v1847_v48 }
 0x223   : > { %3141 = vst [vmem:[%s4454_s19 + $0xf8] sm:$0xff] %v3045_v0 }
 0x225   : > { %v1937_v1 = vpop.f32.mrf.mxu2  ;;  %v1762_v6 = vpop.f32.mrf.mxu0 }
 0x226   : > { %v2026_v4 = vpop.f32.mrf.mxu3  ;;  %v1851_v12 = vpop.f32.mrf.mxu1 }
 0x227   : > { %v2027_v10 = vadd.f32 %v2026_v4, %v1937_v1  ;;  %v1852_v14 = vadd.f32 %v1851_v12, %v1762_v6 }
 0x228   : > { %1801 = vmatmul.bf16.gmra.mxu0 %v4527_v56 }
 0x229   : > { %v3048_v13 = vpack.c.bf16 %v2027_v10, %v1849_v7  ;;  %1890 = vmatmul.bf16.gmra.mxu1 %v4529_v62 }
 0x22a   : > { %1979 = vmatmul.bf16.gmra.mxu2 %v4527_v56 }
 0x22b   : > { %3144 = vst [vmem:[%s4454_s19 + $0x110] sm:$0xff] %v3048_v13  ;;  %2068 = vmatmul.bf16.gmra.mxu3 %v4529_v62 }
 0x22d   : > { %v1940_v16 = vpop.f32.mrf.mxu2  ;;  %v1764_v19 = vpop.f32.mrf.mxu0 }
 0x22e   : > { %v2029_v18 = vpop.f32.mrf.mxu3  ;;  %v1853_v25 = vpop.f32.mrf.mxu1 }
 0x22f   : > { %v2030_v20 = vadd.f32 %v2029_v18, %v1940_v16  ;;  %v1854_v36 = vadd.f32 %v1853_v25, %v1764_v19 }
 0x231   : > { %v3051_v28 = vpack.c.bf16 %v2030_v20, %v1852_v14 }
 0x233   : > { %3147 = vst [vmem:[%s4454_s19 + $0x128] sm:$0xff] %v3051_v28 }
 0x235   : > { %v1942_v30 = vpop.f32.mrf.mxu2  ;;  %v1767_v35 = vpop.f32.mrf.mxu0 }
 0x236   : > { %v2031_v34 = vpop.f32.mrf.mxu3  ;;  %v1856_v39 = vpop.f32.mrf.mxu1 }
 0x237   : > { %v2032_v37 = vadd.f32 %v2031_v34, %v1942_v30  ;;  %v1857_v42 = vadd.f32 %v1856_v39, %v1767_v35 }
 0x238   : > { %1806 = vmatmul.bf16.gmra.mxu0 %v4541_v49 }
 0x239   : > { %v3054_v40 = vpack.c.bf16 %v2032_v37, %v1854_v36  ;;  %1895 = vmatmul.bf16.gmra.mxu1 %v4543_v55 }
 0x23a   : > { %1984 = vmatmul.bf16.gmra.mxu2 %v4541_v49 }
 0x23b   : > { %3150 = vst [vmem:[%s4454_s19 + $0x140] sm:$0xff] %v3054_v40  ;;  %2073 = vmatmul.bf16.gmra.mxu3 %v4543_v55 }
 0x23d   : > { %v1945_v44 = vpop.f32.mrf.mxu2  ;;  %v1769_v46 = vpop.f32.mrf.mxu0 }
 0x23e   : > { %v2034_v45 = vpop.f32.mrf.mxu3  ;;  %v1858_v50 = vpop.f32.mrf.mxu1 }
 0x23f   : > { %v2035_v48 = vadd.f32 %v2034_v45, %v1945_v44  ;;  %v1859_v0 = vadd.f32 %v1858_v50, %v1769_v46 }
 0x241   : > { %v3057_v51 = vpack.c.bf16 %v2035_v48, %v1857_v42 }
 0x243   : > { %3153 = vst [vmem:[%s4454_s19 + $0x158] sm:$0xff] %v3057_v51 }
 0x245   : > { %v1947_v54 = vpop.f32.mrf.mxu2  ;;  %v1772_v61 = vpop.f32.mrf.mxu0 }
 0x246   : > { %v2036_v60 = vpop.f32.mrf.mxu3  ;;  %v1861_v4 = vpop.f32.mrf.mxu1 }
 0x247   : > { %v2037_v1 = vadd.f32 %v2036_v60, %v1947_v54  ;;  %v1862_v7 = vadd.f32 %v1861_v4, %v1772_v61 }
 0x248   : > { %2087 = vmatmul.bf16.vlgmr.msra.gmra.mxu0 %v4345_v43 }
 0x249   : > { %v3060_v6 = vpack.c.bf16 %v2037_v1, %v1859_v0  ;;  %2176 = vmatmul.bf16.vlgmr.msra.gmra.mxu1 %v4347_v47 }
 0x24a   : > { %2265 = vmatmul.bf16.vlgmr.msra.gmra.mxu2 %v4345_v43 }
 0x24b   : > { %3156 = vst [vmem:[%s4454_s19 + $0x170] sm:$0xff] %v3060_v6  ;;  %2354 = vmatmul.bf16.vlgmr.msra.gmra.mxu3 %v4347_v47 }
 0x24d   : > { %v1950_v10 = vpop.f32.mrf.mxu2  ;;  %v1774_v13 = vpop.f32.mrf.mxu0 }
 0x24e   : > { %v2039_v12 = vpop.f32.mrf.mxu3  ;;  %v1863_v16 = vpop.f32.mrf.mxu1 }
 0x24f   : > { %v2040_v14 = vadd.f32 %v2039_v12, %v1950_v10  ;;  %v1864_v28 = vadd.f32 %v1863_v16, %v1774_v13 }
 0x251   : > { %v3063_v18 = vpack.c.bf16 %v2040_v14, %v1862_v7 }
 0x253   : > { %3159 = vst [vmem:[%s4454_s19 + $0x188] sm:$0xff] %v3063_v18 }
 0x255   : > { %v1952_v19 = vpop.f32.mrf.mxu2  ;;  %v1777_v25 = vpop.f32.mrf.mxu0 }
 0x256   : > { %v2041_v20 = vpop.f32.mrf.mxu3  ;;  %v1866_v34 = vpop.f32.mrf.mxu1 }
 0x257   : > { %v2042_v30 = vadd.f32 %v2041_v20, %v1952_v19  ;;  %v1867_v47 = vadd.f32 %v1866_v34, %v1777_v25 }
 0x258   : > { %2092 = vmatmul.bf16.gmra.mxu0 %v4357_v2 }
 0x259   : > { %v3066_v43 = vpack.c.bf16 %v2042_v30, %v1864_v28  ;;  %2181 = vmatmul.bf16.gmra.mxu1 %v4359_v3 }
 0x25a   : > { %2270 = vmatmul.bf16.gmra.mxu2 %v4357_v2 }
 0x25b   : > { %3162 = vst [vmem:[%s4454_s19 + $0x1a0] sm:$0xff] %v3066_v43  ;;  %2359 = vmatmul.bf16.gmra.mxu3 %v4359_v3 }
 0x25d   : > { %v1955_v35 = vpop.f32.mrf.mxu2  ;;  %v1779_v37 = vpop.f32.mrf.mxu0 }
 0x25e   : > { %v2044_v36 = vpop.f32.mrf.mxu3  ;;  %v1868_v40 = vpop.f32.mrf.mxu1 }
 0x25f   : > { %v2045_v39 = vadd.f32 %v2044_v36, %v1955_v35  ;;  %v1869_v48 = vadd.f32 %v1868_v40, %v1779_v37 }
 0x261   : > { %v3069_v42 = vpack.c.bf16 %v2045_v39, %v1867_v47 }
 0x263   : > { %3165 = vst [vmem:[%s4454_s19 + $0x1b8] sm:$0xff] %v3069_v42 }
 0x265   : > { %v1957_v44 = vpop.f32.mrf.mxu2  ;;  %v1782_v46 = vpop.f32.mrf.mxu0 }
 0x266   : > { %v2046_v45 = vpop.f32.mrf.mxu3  ;;  %v1871_v51 = vpop.f32.mrf.mxu1 }
 0x267   : > { %v2047_v50 = vadd.f32 %v2046_v45, %v1957_v44  ;;  %v1872_v3 = vadd.f32 %v1871_v51, %v1782_v46 }
 0x268   : > { %2097 = vmatmul.bf16.gmra.mxu0 %v4369_v8 }
 0x269   : > { %v3072_v2 = vpack.c.bf16 %v2047_v50, %v1869_v48  ;;  %2186 = vmatmul.bf16.gmra.mxu1 %v4371_v9 }
 0x26a   : > { %2275 = vmatmul.bf16.gmra.mxu2 %v4369_v8 }
 0x26b   : > { %3168 = vst [vmem:[%s4454_s19 + $0x1d0] sm:$0xff] %v3072_v2  ;;  %2364 = vmatmul.bf16.gmra.mxu3 %v4371_v9 }
 0x26d   : > { %v1960_v54 = vpop.f32.mrf.mxu2  ;;  %v1784_v61 = vpop.f32.mrf.mxu0 }
 0x26e   : > { %v2049_v60 = vpop.f32.mrf.mxu3  ;;  %v1873_v1 = vpop.f32.mrf.mxu1 }
 0x26f   : > { %v2050_v0 = vadd.f32 %v2049_v60, %v1960_v54  ;;  %v1874_v12 = vadd.f32 %v1873_v1, %v1784_v61 }
 0x271   : > { %v3075_v4 = vpack.c.bf16 %v2050_v0, %v1872_v3 }
 0x273   : > { %3171 = vst [vmem:[%s4454_s19 + $0x1e8] sm:$0xff] %v3075_v4 }
 0x275   : > { %v1962_v6 = vpop.f32.mrf.mxu2  ;;  %v1787_v10 = vpop.f32.mrf.mxu0 }
 0x276   : > { %v2051_v7 = vpop.f32.mrf.mxu3  ;;  %v1876_v14 = vpop.f32.mrf.mxu1 }
 0x277   : > { %v2052_v13 = vadd.f32 %v2051_v7, %v1962_v6  ;;  %v1877_v9 = vadd.f32 %v1876_v14, %v1787_v10 }
 0x278   : > { %2102 = vmatmul.bf16.gmra.mxu0 %v4381_v26 }
 0x279   : > { %v3078_v8 = vpack.c.bf16 %v2052_v13, %v1874_v12  ;;  %2191 = vmatmul.bf16.gmra.mxu1 %v4383_v27 }
 0x27a   : > { %2280 = vmatmul.bf16.gmra.mxu2 %v4381_v26 }
 0x27b   : > { %3174 = vst [vmem:[%s4454_s19 + $0x200] sm:$0xff] %v3078_v8  ;;  %2369 = vmatmul.bf16.gmra.mxu3 %v4383_v27 }
 0x27d   : > { %v1965_v16 = vpop.f32.mrf.mxu2  ;;  %v1789_v19 = vpop.f32.mrf.mxu0 }
 0x27e   : > { %v2054_v18 = vpop.f32.mrf.mxu3  ;;  %v1878_v25 = vpop.f32.mrf.mxu1 }
 0x27f   : > { %v2055_v20 = vadd.f32 %v2054_v18, %v1965_v16  ;;  %v1879_v47 = vadd.f32 %v1878_v25, %v1789_v19 }
 0x281   : > { %v3081_v28 = vpack.c.bf16 %v2055_v20, %v1877_v9 }
 0x283   : > { %3177 = vst [vmem:[%s4454_s19 + $0x218] sm:$0xff] %v3081_v28 }
 0x285   : > { %v1967_v30 = vpop.f32.mrf.mxu2  ;;  %v1792_v43 = vpop.f32.mrf.mxu0 }
 0x286   : > { %v2056_v34 = vpop.f32.mrf.mxu3  ;;  %v1881_v36 = vpop.f32.mrf.mxu1 }
 0x287   : > { %v2057_v35 = vadd.f32 %v2056_v34, %v1967_v30  ;;  %v1882_v27 = vadd.f32 %v1881_v36, %v1792_v43 }
 0x288   : > { %2107 = vmatmul.bf16.gmra.mxu0 %v4393_v32 }
 0x289   : > { %v3084_v26 = vpack.c.bf16 %v2057_v35, %v1879_v47  ;;  %2196 = vmatmul.bf16.gmra.mxu1 %v4395_v33 }
 0x28a   : > { %2285 = vmatmul.bf16.gmra.mxu2 %v4393_v32 }
 0x28b   : > { %3180 = vst [vmem:[%s4454_s19 + $0x230] sm:$0xff] %v3084_v26  ;;  %2374 = vmatmul.bf16.gmra.mxu3 %v4395_v33 }
 0x28d   : > { %v1970_v37 = vpop.f32.mrf.mxu2  ;;  %v1794_v40 = vpop.f32.mrf.mxu0 }
 0x28e   : > { %v2059_v39 = vpop.f32.mrf.mxu3  ;;  %v1883_v44 = vpop.f32.mrf.mxu1 }
 0x28f   : > { %v2060_v42 = vadd.f32 %v2059_v39, %v1970_v37  ;;  %v1884_v51 = vadd.f32 %v1883_v44, %v1794_v40 }
 0x291   : > { %v3087_v45 = vpack.c.bf16 %v2060_v42, %v1882_v27 }
 0x293   : > { %3183 = vst [vmem:[%s4454_s19 + $0x248] sm:$0xff] %v3087_v45 }
 0x295   : > { %v1972_v46 = vpop.f32.mrf.mxu2  ;;  %v1797_v50 = vpop.f32.mrf.mxu0 }
 0x296   : > { %v2061_v48 = vpop.f32.mrf.mxu3  ;;  %v1886_v3 = vpop.f32.mrf.mxu1 }
 0x297   : > { %v2062_v2 = vadd.f32 %v2061_v48, %v1972_v46  ;;  %v1887_v33 = vadd.f32 %v1886_v3, %v1797_v50 }
 0x298   : > { %2112 = vmatmul.bf16.gmra.mxu0 %v4405_v52 }
 0x299   : > { %v3090_v32 = vpack.c.bf16 %v2062_v2, %v1884_v51  ;;  %2201 = vmatmul.bf16.gmra.mxu1 %v4407_v53 }
 0x29a   : > { %2290 = vmatmul.bf16.gmra.mxu2 %v4405_v52 }
 0x29b   : > { %3186 = vst [vmem:[%s4454_s19 + $0x260] sm:$0xff] %v3090_v32  ;;  %2379 = vmatmul.bf16.gmra.mxu3 %v4407_v53 }
 0x29d   : > { %v1975_v54 = vpop.f32.mrf.mxu2  ;;  %v1799_v61 = vpop.f32.mrf.mxu0 }
 0x29e   : > { %v2064_v60 = vpop.f32.mrf.mxu3  ;;  %v1888_v1 = vpop.f32.mrf.mxu1 }
 0x29f   : > { %v2065_v0 = vadd.f32 %v2064_v60, %v1975_v54  ;;  %v1889_v12 = vadd.f32 %v1888_v1, %v1799_v61 }
 0x2a1   : > { %v3093_v4 = vpack.c.bf16 %v2065_v0, %v1887_v33 }
 0x2a3   : > { %3189 = vst [vmem:[%s4454_s19 + $0x278] sm:$0xff] %v3093_v4 }
 0x2a5   : > { %v1977_v6 = vpop.f32.mrf.mxu2  ;;  %v1802_v10 = vpop.f32.mrf.mxu0 }
 0x2a6   : > { %v2066_v7 = vpop.f32.mrf.mxu3  ;;  %v1891_v14 = vpop.f32.mrf.mxu1 }
 0x2a7   : > { %v2067_v13 = vadd.f32 %v2066_v7, %v1977_v6  ;;  %v1892_v53 = vadd.f32 %v1891_v14, %v1802_v10 }
 0x2a8   : > { %2117 = vmatmul.bf16.gmra.mxu0 %v4417_v58 }
 0x2a9   : > { %v3096_v52 = vpack.c.bf16 %v2067_v13, %v1889_v12  ;;  %2206 = vmatmul.bf16.gmra.mxu1 %v4419_v59 }
 0x2aa   : > { %2295 = vmatmul.bf16.gmra.mxu2 %v4417_v58 }
 0x2ab   : > { %3192 = vst [vmem:[%s4454_s19 + $0x290] sm:$0xff] %v3096_v52  ;;  %2384 = vmatmul.bf16.gmra.mxu3 %v4419_v59 }
 0x2ad   : > { %v1980_v8 = vpop.f32.mrf.mxu2  ;;  %v1804_v16 = vpop.f32.mrf.mxu0 }
 0x2ae   : > { %v2069_v9 = vpop.f32.mrf.mxu3  ;;  %v1893_v19 = vpop.f32.mrf.mxu1 }
 0x2af   : > { %v2070_v18 = vadd.f32 %v2069_v9, %v1980_v8  ;;  %v1894_v34 = vadd.f32 %v1893_v19, %v1804_v16 }
 0x2b1   : > { %v3099_v20 = vpack.c.bf16 %v2070_v18, %v1892_v53 }
 0x2b3   : > { %3195 = vst [vmem:[%s4454_s19 + $0x2a8] sm:$0xff] %v3099_v20 }
 0x2b5   : > { %v1982_v25 = vpop.f32.mrf.mxu2  ;;  %v1807_v30 = vpop.f32.mrf.mxu0 }
 0x2b6   : > { %v2071_v28 = vpop.f32.mrf.mxu3  ;;  %v1896_v47 = vpop.f32.mrf.mxu1 }
 0x2b7   : > { %v2072_v43 = vadd.f32 %v2071_v28, %v1982_v25  ;;  %v1897_v59 = vadd.f32 %v1896_v47, %v1807_v30 }
 0x2b8   : > { %2122 = vmatmul.bf16.gmra.mxu0 %v4429_v15 }
 0x2b9   : > { %v3102_v58 = vpack.c.bf16 %v2072_v43, %v1894_v34  ;;  %2211 = vmatmul.bf16.gmra.mxu1 %v4431_v17 }
 0x2ba   : > { %2300 = vmatmul.bf16.gmra.mxu2 %v4429_v15 }
 0x2bb   : > { %3198 = vst [vmem:[%s4454_s19 + $0x2c0] sm:$0xff] %v3102_v58  ;;  %2389 = vmatmul.bf16.gmra.mxu3 %v4431_v17 }
 0x2bd   : > { %v1985_v35 = vpop.f32.mrf.mxu2  ;;  %v1809_v26 = vpop.f32.mrf.mxu0 }
 0x2be   : > { %v2074_v36 = vpop.f32.mrf.mxu3  ;;  %v1898_v37 = vpop.f32.mrf.mxu1 }
 0x2bf   : > { %v2075_v27 = vadd.f32 %v2074_v36, %v1985_v35  ;;  %v1899_v45 = vadd.f32 %v1898_v37, %v1809_v26 }
 0x2c1   : > { %v3105_v39 = vpack.c.bf16 %v2075_v27, %v1897_v59 }
 0x2c3   : > { %3201 = vst [vmem:[%s4454_s19 + $0x2d8] sm:$0xff] %v3105_v39 }
 0x2c5   : > { %v1987_v40 = vpop.f32.mrf.mxu2  ;;  %v2088_v44 = vpop.f32.mrf.mxu0 }
 0x2c6   : > { %v2076_v42 = vpop.f32.mrf.mxu3  ;;  %v2177_v48 = vpop.f32.mrf.mxu1 }
 0x2c7   : > { %v2077_v46 = vadd.f32 %v2076_v42, %v1987_v40  ;;  %v2178_v17 = vadd.f32 %v2177_v48, %v2088_v44 }
 0x2c8   : > { %2127 = vmatmul.bf16.gmra.mxu0 %v4441_v22 }
 0x2c9   : > { %v3108_v15 = vpack.c.bf16 %v2077_v46, %v1899_v45  ;;  %2216 = vmatmul.bf16.gmra.mxu1 %v4443_v24 }
 0x2ca   : > { %2305 = vmatmul.bf16.gmra.mxu2 %v4441_v22 }
 0x2cb   : > { %3204 = vst [vmem:[%s4454_s19 + $0x2f0] sm:$0xff] %v3108_v15  ;;  %2394 = vmatmul.bf16.gmra.mxu3 %v4443_v24 }
 0x2cd   : > { %v2266_v50 = vpop.f32.mrf.mxu2  ;;  %v2090_v2 = vpop.f32.mrf.mxu0 }
 0x2ce   : > { %v2355_v51 = vpop.f32.mrf.mxu3  ;;  %v2179_v32 = vpop.f32.mrf.mxu1 }
 0x2cf   : > { %v2356_v3 = vadd.f32 %v2355_v51, %v2266_v50  ;;  %v2180_v0 = vadd.f32 %v2179_v32, %v2090_v2 }
 0x2d1   : > { %v3016_v33 = vpack.c.bf16 %v2356_v3, %v2178_v17 }
 0x2d3   : > { %3112 = vst [vmem:[%s4454_s19 + $0x10] sm:$0xff] %v3016_v33 }
 0x2d5   : > { %v2268_v54 = vpop.f32.mrf.mxu2  ;;  %v2093_v61 = vpop.f32.mrf.mxu0 }
 0x2d6   : > { %v2357_v60 = vpop.f32.mrf.mxu3  ;;  %v2182_v4 = vpop.f32.mrf.mxu1 }
 0x2d7   : > { %v2358_v1 = vadd.f32 %v2357_v60, %v2268_v54  ;;  %v2183_v24 = vadd.f32 %v2182_v4, %v2093_v61 }
 0x2d8   : > { %2132 = vmatmul.bf16.gmra.mxu0 %v4457_v57 }
 0x2d9   : > { %v3019_v22 = vpack.c.bf16 %v2358_v1, %v2180_v0  ;;  %2221 = vmatmul.bf16.gmra.mxu1 %v4459_v63 }
 0x2da   : > { %2310 = vmatmul.bf16.gmra.mxu2 %v4457_v57 }
 0x2db   : > { %3115 = vst [vmem:[%s4454_s19 + $0x28] sm:$0xff] %v3019_v22  ;;  %2399 = vmatmul.bf16.gmra.mxu3 %v4459_v63 }
 0x2dd   : > { %v2271_v6 = vpop.f32.mrf.mxu2  ;;  %v2095_v10 = vpop.f32.mrf.mxu0 }
 0x2de   : > { %v2360_v7 = vpop.f32.mrf.mxu3  ;;  %v2184_v13 = vpop.f32.mrf.mxu1 }
 0x2df   : > { %v2361_v12 = vadd.f32 %v2360_v7, %v2271_v6  ;;  %v2185_v9 = vadd.f32 %v2184_v13, %v2095_v10 }
 0x2e1   : > { %v3022_v14 = vpack.c.bf16 %v2361_v12, %v2183_v24 }
 0x2e3   : > { %3118 = vst [vmem:[%s4454_s19 + $0x40] sm:$0xff] %v3022_v14 }
 0x2e5   : > { %v2273_v52 = vpop.f32.mrf.mxu2  ;;  %v2098_v8 = vpop.f32.mrf.mxu0 }
 0x2e6   : > { %v2362_v53 = vpop.f32.mrf.mxu3  ;;  %v2187_v18 = vpop.f32.mrf.mxu1 }
 0x2e7   : > { %v2363_v16 = vadd.f32 %v2362_v53, %v2273_v52  ;;  %v2188_v63 = vadd.f32 %v2187_v18, %v2098_v8 }
 0x2e8   : > { %2137 = vmatmul.bf16.gmra.mxu0 %v4471_v23 }
 0x2e9   : > { %v3025_v57 = vpack.c.bf16 %v2363_v16, %v2185_v9  ;;  %2226 = vmatmul.bf16.gmra.mxu1 %v4473_v29 }
 0x2ea   : > { %2315 = vmatmul.bf16.gmra.mxu2 %v4471_v23 }
 0x2eb   : > { %3121 = vst [vmem:[%s4454_s19 + $0x58] sm:$0xff] %v3025_v57  ;;  %2404 = vmatmul.bf16.gmra.mxu3 %v4473_v29 }
 0x2ed   : > { %v2276_v19 = vpop.f32.mrf.mxu2  ;;  %v2100_v25 = vpop.f32.mrf.mxu0 }
 0x2ee   : > { %v2365_v20 = vpop.f32.mrf.mxu3  ;;  %v2189_v30 = vpop.f32.mrf.mxu1 }
 0x2ef   : > { %v2366_v28 = vadd.f32 %v2365_v20, %v2276_v19  ;;  %v2190_v59 = vadd.f32 %v2189_v30, %v2100_v25 }
 0x2f1   : > { %v3028_v34 = vpack.c.bf16 %v2366_v28, %v2188_v63 }
 0x2f3   : > { %3124 = vst [vmem:[%s4454_s19 + $0x70] sm:$0xff] %v3028_v34 }
 0x2f5   : > { %v2278_v43 = vpop.f32.mrf.mxu2  ;;  %v2103_v58 = vpop.f32.mrf.mxu0 }
 0x2f6   : > { %v2367_v47 = vpop.f32.mrf.mxu3  ;;  %v2192_v36 = vpop.f32.mrf.mxu1 }
 0x2f7   : > { %v2368_v35 = vadd.f32 %v2367_v47, %v2278_v43  ;;  %v2193_v29 = vadd.f32 %v2192_v36, %v2103_v58 }
 0x2f8   : > { %2142 = vmatmul.bf16.gmra.mxu0 %v4485_v5 }
 0x2f9   : > { %v3031_v23 = vpack.c.bf16 %v2368_v35, %v2190_v59  ;;  %2231 = vmatmul.bf16.gmra.mxu1 %v4487_v11 }
 0x2fa   : > { %2320 = vmatmul.bf16.gmra.mxu2 %v4485_v5 }
 0x2fb   : > { %3127 = vst [vmem:[%s4454_s19 + $0x88] sm:$0xff] %v3031_v23  ;;  %2409 = vmatmul.bf16.gmra.mxu3 %v4487_v11 }
 0x2fd   : > { %v2281_v26 = vpop.f32.mrf.mxu2  ;;  %v2105_v37 = vpop.f32.mrf.mxu0 }
 0x2fe   : > { %v2370_v27 = vpop.f32.mrf.mxu3  ;;  %v2194_v40 = vpop.f32.mrf.mxu1 }
 0x2ff   : > { %v2371_v39 = vadd.f32 %v2370_v27, %v2281_v26  ;;  %v2195_v48 = vadd.f32 %v2194_v40, %v2105_v37 }
 0x301   : > { %v3034_v42 = vpack.c.bf16 %v2371_v39, %v2193_v29 }
 0x303   : > { %3130 = vst [vmem:[%s4454_s19 + $0xa0] sm:$0xff] %v3034_v42 }
 0x305   : > { %v2283_v44 = vpop.f32.mrf.mxu2  ;;  %v2108_v46 = vpop.f32.mrf.mxu0 }
 0x306   : > { %v2372_v45 = vpop.f32.mrf.mxu3  ;;  %v2197_v17 = vpop.f32.mrf.mxu1 }
 0x307   : > { %v2373_v15 = vadd.f32 %v2372_v45, %v2283_v44  ;;  %v2198_v11 = vadd.f32 %v2197_v17, %v2108_v46 }
 0x308   : > { %2147 = vmatmul.bf16.gmra.mxu0 %v4499_v38 }
 0x309   : > { %v3037_v5 = vpack.c.bf16 %v2373_v15, %v2195_v48  ;;  %2236 = vmatmul.bf16.gmra.mxu1 %v4501_v41 }
 0x30a   : > { %2325 = vmatmul.bf16.gmra.mxu2 %v4499_v38 }
 0x30b   : > { %3133 = vst [vmem:[%s4454_s19 + $0xb8] sm:$0xff] %v3037_v5  ;;  %2414 = vmatmul.bf16.gmra.mxu3 %v4501_v41 }
 0x30d   : > { %v2286_v50 = vpop.f32.mrf.mxu2  ;;  %v2110_v2 = vpop.f32.mrf.mxu0 }
 0x30e   : > { %v2375_v51 = vpop.f32.mrf.mxu3  ;;  %v2199_v32 = vpop.f32.mrf.mxu1 }
 0x30f   : > { %v2376_v3 = vadd.f32 %v2375_v51, %v2286_v50  ;;  %v2200_v0 = vadd.f32 %v2199_v32, %v2110_v2 }
 0x311   : > { %v3040_v33 = vpack.c.bf16 %v2376_v3, %v2198_v11 }
 0x313   : > { %3136 = vst [vmem:[%s4454_s19 + $0xd0] sm:$0xff] %v3040_v33 }
 0x315   : > { %v2288_v54 = vpop.f32.mrf.mxu2  ;;  %v2113_v61 = vpop.f32.mrf.mxu0 }
 0x316   : > { %v2377_v60 = vpop.f32.mrf.mxu3  ;;  %v2202_v4 = vpop.f32.mrf.mxu1 }
 0x317   : > { %v2378_v1 = vadd.f32 %v2377_v60, %v2288_v54  ;;  %v2203_v41 = vadd.f32 %v2202_v4, %v2113_v61 }
 0x318   : > { %2152 = vmatmul.bf16.gmra.mxu0 %v4513_v21 }
 0x319   : > { %v3043_v38 = vpack.c.bf16 %v2378_v1, %v2200_v0  ;;  %2241 = vmatmul.bf16.gmra.mxu1 %v4515_v31 }
 0x31a   : > { %2330 = vmatmul.bf16.gmra.mxu2 %v4513_v21 }
 0x31b   : > { %3139 = vst [vmem:[%s4454_s19 + $0xe8] sm:$0xff] %v3043_v38  ;;  %2419 = vmatmul.bf16.gmra.mxu3 %v4515_v31 }
 0x31d   : > { %v2291_v22 = vpop.f32.mrf.mxu2  ;;  %v2115_v6 = vpop.f32.mrf.mxu0 }
 0x31e   : > { %v2380_v24 = vpop.f32.mrf.mxu3  ;;  %v2204_v10 = vpop.f32.mrf.mxu1 }
 0x31f   : > { %v2381_v7 = vadd.f32 %v2380_v24, %v2291_v22  ;;  %v2205_v53 = vadd.f32 %v2204_v10, %v2115_v6 }
 0x321   : > { %v3046_v12 = vpack.c.bf16 %v2381_v7, %v2203_v41 }
 0x323   : > { %3142 = vst [vmem:[%s4454_s19 + $0x100] sm:$0xff] %v3046_v12 }
 0x325   : > { %v2293_v13 = vpop.f32.mrf.mxu2  ;;  %v2118_v52 = vpop.f32.mrf.mxu0 }
 0x326   : > { %v2382_v14 = vpop.f32.mrf.mxu3  ;;  %v2207_v9 = vpop.f32.mrf.mxu1 }
 0x327   : > { %v2383_v8 = vadd.f32 %v2382_v14, %v2293_v13  ;;  %v2208_v31 = vadd.f32 %v2207_v9, %v2118_v52 }
 0x328   : > { %2157 = vmatmul.bf16.gmra.mxu0 %v4527_v56 }
 0x329   : > { %v3049_v21 = vpack.c.bf16 %v2383_v8, %v2205_v53  ;;  %2246 = vmatmul.bf16.gmra.mxu1 %v4529_v62 }
 0x32a   : > { %2335 = vmatmul.bf16.gmra.mxu2 %v4527_v56 }
 0x32b   : > { %3145 = vst [vmem:[%s4454_s19 + $0x118] sm:$0xff] %v3049_v21  ;;  %2424 = vmatmul.bf16.gmra.mxu3 %v4529_v62 }
 0x32d   : > { %v2296_v16 = vpop.f32.mrf.mxu2  ;;  %v2120_v57 = vpop.f32.mrf.mxu0 }
 0x32e   : > { %v2385_v18 = vpop.f32.mrf.mxu3  ;;  %v2209_v19 = vpop.f32.mrf.mxu1 }
 0x32f   : > { %v2386_v63 = vadd.f32 %v2385_v18, %v2296_v16  ;;  %v2210_v34 = vadd.f32 %v2209_v19, %v2120_v57 }
 0x331   : > { %v3052_v20 = vpack.c.bf16 %v2386_v63, %v2208_v31 }
 0x333   : > { %3148 = vst [vmem:[%s4454_s19 + $0x130] sm:$0xff] %v3052_v20 }
 0x335   : > { %v2298_v25 = vpop.f32.mrf.mxu2  ;;  %v2123_v30 = vpop.f32.mrf.mxu0 }
 0x336   : > { %v2387_v28 = vpop.f32.mrf.mxu3  ;;  %v2212_v47 = vpop.f32.mrf.mxu1 }
 0x337   : > { %v2388_v43 = vadd.f32 %v2387_v28, %v2298_v25  ;;  %v2213_v62 = vadd.f32 %v2212_v47, %v2123_v30 }
 0x338   : > { %2162 = vmatmul.bf16.gmra.mxu0 %v4541_v49 }
 0x339   : > { %v3055_v56 = vpack.c.bf16 %v2388_v43, %v2210_v34  ;;  %2251 = vmatmul.bf16.gmra.mxu1 %v4543_v55 }
 0x33a   : > { %2340 = vmatmul.bf16.gmra.mxu2 %v4541_v49 }
 0x33b   : > { %3151 = vst [vmem:[%s4454_s19 + $0x148] sm:$0xff] %v3055_v56  ;;  %2429 = vmatmul.bf16.gmra.mxu3 %v4543_v55 }
 0x33d   : > { %v2301_v58 = vpop.f32.mrf.mxu2  ;;  %v2125_v35 = vpop.f32.mrf.mxu0 }
 0x33e   : > { %v2390_v59 = vpop.f32.mrf.mxu3  ;;  %v2214_v23 = vpop.f32.mrf.mxu1 }
 0x33f   : > { %v2391_v36 = vadd.f32 %v2390_v59, %v2301_v58  ;;  %v2215_v39 = vadd.f32 %v2214_v23, %v2125_v35 }
 0x341   : > { %v3058_v29 = vpack.c.bf16 %v2391_v36, %v2213_v62 }
 0x343   : > { %3154 = vst [vmem:[%s4454_s19 + $0x160] sm:$0xff] %v3058_v29 }
 0x345   : > { %v2303_v26 = vpop.f32.mrf.mxu2  ;;  %v2128_v37 = vpop.f32.mrf.mxu0 }
 0x346   : > { %v2392_v27 = vpop.f32.mrf.mxu3  ;;  %v2217_v42 = vpop.f32.mrf.mxu1 }
 0x347   : > { %v2393_v40 = vadd.f32 %v2392_v27, %v2303_v26  ;;  %v2218_v55 = vadd.f32 %v2217_v42, %v2128_v37 }
 0x349   : > { %v3061_v49 = vpack.c.bf16 %v2393_v40, %v2215_v39 }
 0x34b   : > { %3157 = vst [vmem:[%s4454_s19 + $0x178] sm:$0xff] %v3061_v49 }
 0x34d   : > { %v2306_v44 = vpop.f32.mrf.mxu2  ;;  %v2130_v46 = vpop.f32.mrf.mxu0 }
 0x34e   : > { %v2395_v45 = vpop.f32.mrf.mxu3  ;;  %v2219_v15 = vpop.f32.mrf.mxu1 }
 0x34f   : > { %v2396_v48 = vadd.f32 %v2395_v45, %v2306_v44  ;;  %v2220_v51 = vadd.f32 %v2219_v15, %v2130_v46 }
 0x351   : > { %v3064_v17 = vpack.c.bf16 %v2396_v48, %v2218_v55 }
 0x353   : > { %3160 = vst [vmem:[%s4454_s19 + $0x190] sm:$0xff] %v3064_v17 }
 0x355   : > { %v2308_v5 = vpop.f32.mrf.mxu2  ;;  %v2133_v50 = vpop.f32.mrf.mxu0 }
 0x356   : > { %v2397_v11 = vpop.f32.mrf.mxu3  ;;  %v2222_v3 = vpop.f32.mrf.mxu1 }
 0x357   : > { %v2398_v2 = vadd.f32 %v2397_v11, %v2308_v5  ;;  %v2223_v33 = vadd.f32 %v2222_v3, %v2133_v50 }
 0x359   : > { %v3067_v32 = vpack.c.bf16 %v2398_v2, %v2220_v51 }
 0x35b   : > { %3163 = vst [vmem:[%s4454_s19 + $0x1a8] sm:$0xff] %v3067_v32 }
 0x35d   : > { %v2311_v54 = vpop.f32.mrf.mxu2  ;;  %v2135_v61 = vpop.f32.mrf.mxu0 }
 0x35e   : > { %v2400_v60 = vpop.f32.mrf.mxu3  ;;  %v2224_v1 = vpop.f32.mrf.mxu1 }
 0x35f   : > { %v2401_v0 = vadd.f32 %v2400_v60, %v2311_v54  ;;  %v2225_v24 = vadd.f32 %v2224_v1, %v2135_v61 }
 0x361   : > { %v3070_v4 = vpack.c.bf16 %v2401_v0, %v2223_v33 }
 0x363   : > { %3166 = vst [vmem:[%s4454_s19 + $0x1c0] sm:$0xff] %v3070_v4 }
 0x365   : > { %v2313_v38 = vpop.f32.mrf.mxu2  ;;  %v2138_v22 = vpop.f32.mrf.mxu0 }
 0x366   : > { %v2402_v41 = vpop.f32.mrf.mxu3  ;;  %v2227_v7 = vpop.f32.mrf.mxu1 }
 0x367   : > { %v2403_v6 = vadd.f32 %v2402_v41, %v2313_v38  ;;  %v2228_v12 = vadd.f32 %v2227_v7, %v2138_v22 }
 0x369   : > { %v3073_v10 = vpack.c.bf16 %v2403_v6, %v2225_v24 }
 0x36b   : > { %3169 = vst [vmem:[%s4454_s19 + $0x1d8] sm:$0xff] %v3073_v10 }
 0x36d   : > { %v2316_v13 = vpop.f32.mrf.mxu2  ;;  %v2140_v52 = vpop.f32.mrf.mxu0 }
 0x36e   : > { %v2405_v14 = vpop.f32.mrf.mxu3  ;;  %v2229_v8 = vpop.f32.mrf.mxu1 }
 0x36f   : > { %v2406_v53 = vadd.f32 %v2405_v14, %v2316_v13  ;;  %v2230_v18 = vadd.f32 %v2229_v8, %v2140_v52 }
 0x371   : > { %v3076_v9 = vpack.c.bf16 %v2406_v53, %v2228_v12 }
 0x373   : > { %3172 = vst [vmem:[%s4454_s19 + $0x1f0] sm:$0xff] %v3076_v9 }
 0x375   : > { %v2318_v21 = vpop.f32.mrf.mxu2  ;;  %v2143_v16 = vpop.f32.mrf.mxu0 }
 0x376   : > { %v2407_v31 = vpop.f32.mrf.mxu3  ;;  %v2232_v63 = vpop.f32.mrf.mxu1 }
 0x377   : > { %v2408_v57 = vadd.f32 %v2407_v31, %v2318_v21  ;;  %v2233_v20 = vadd.f32 %v2232_v63, %v2143_v16 }
 0x379   : > { %v3079_v19 = vpack.c.bf16 %v2408_v57, %v2230_v18 }
 0x37b   : > { %3175 = vst [vmem:[%s4454_s19 + $0x208] sm:$0xff] %v3079_v19 }
 0x37d   : > { %v2321_v25 = vpop.f32.mrf.mxu2  ;;  %v2145_v30 = vpop.f32.mrf.mxu0 }
 0x37e   : > { %v2410_v28 = vpop.f32.mrf.mxu3  ;;  %v2234_v43 = vpop.f32.mrf.mxu1 }
 0x37f   : > { %v2411_v34 = vadd.f32 %v2410_v28, %v2321_v25  ;;  %v2235_v59 = vadd.f32 %v2234_v43, %v2145_v30 }
 0x381   : > { %v3082_v47 = vpack.c.bf16 %v2411_v34, %v2233_v20 }
 0x383   : > { %3178 = vst [vmem:[%s4454_s19 + $0x220] sm:$0xff] %v3082_v47 }
 0x385   : > { %v2323_v56 = vpop.f32.mrf.mxu2  ;;  %v2148_v58 = vpop.f32.mrf.mxu0 }
 0x386   : > { %v2412_v62 = vpop.f32.mrf.mxu3  ;;  %v2237_v36 = vpop.f32.mrf.mxu1 }
 0x387   : > { %v2413_v35 = vadd.f32 %v2412_v62, %v2323_v56  ;;  %v2238_v29 = vadd.f32 %v2237_v36, %v2148_v58 }
 0x389   : > { %v3085_v23 = vpack.c.bf16 %v2413_v35, %v2235_v59 }
 0x38b   : > { %3181 = vst [vmem:[%s4454_s19 + $0x238] sm:$0xff] %v3085_v23 }
 0x38d   : > { %v2326_v26 = vpop.f32.mrf.mxu2  ;;  %v2150_v37 = vpop.f32.mrf.mxu0 }
 0x38e   : > { %v2415_v27 = vpop.f32.mrf.mxu3  ;;  %v2239_v40 = vpop.f32.mrf.mxu1 }
 0x38f   : > { %v2416_v39 = vadd.f32 %v2415_v27, %v2326_v26  ;;  %v2240_v45 = vadd.f32 %v2239_v40, %v2150_v37 }
 0x391   : > { %v3088_v42 = vpack.c.bf16 %v2416_v39, %v2238_v29 }
 0x393   : > { %3184 = vst [vmem:[%s4454_s19 + $0x250] sm:$0xff] %v3088_v42 }
 0x395   : > { %v2328_v49 = vpop.f32.mrf.mxu2  ;;  %v2153_v44 = vpop.f32.mrf.mxu0 }
 0x396   : > { %v2417_v55 = vpop.f32.mrf.mxu3  ;;  %v2242_v48 = vpop.f32.mrf.mxu1 }
 0x397   : > { %v2418_v46 = vadd.f32 %v2417_v55, %v2328_v49  ;;  %v2243_v17 = vadd.f32 %v2242_v48, %v2153_v44 }
 0x399   : > { %v3091_v15 = vpack.c.bf16 %v2418_v46, %v2240_v45 }
 0x39b   : > { %3187 = vst [vmem:[%s4454_s19 + $0x268] sm:$0xff] %v3091_v15 }
 0x39d   : > { %v2331_v5 = vpop.f32.mrf.mxu2  ;;  %v2155_v50 = vpop.f32.mrf.mxu0 }
 0x39e   : > { %v2420_v11 = vpop.f32.mrf.mxu3  ;;  %v2244_v2 = vpop.f32.mrf.mxu1 }
 0x39f   : > { %v2421_v51 = vadd.f32 %v2420_v11, %v2331_v5  ;;  %v2245_v60 = vadd.f32 %v2244_v2, %v2155_v50 }
 0x3a1   : > { %v3094_v3 = vpack.c.bf16 %v2421_v51, %v2243_v17 }
 0x3a3   : > { %3190 = vst [vmem:[%s4454_s19 + $0x280] sm:$0xff] %v3094_v3 }
 0x3a5   : > { %v2333_v32 = vpop.f32.mrf.mxu2  ;;  %v2158_v54 = vpop.f32.mrf.mxu0 }
 0x3a6   : > { %v2422_v33 = vpop.f32.mrf.mxu3  ;;  %v2247_v0 = vpop.f32.mrf.mxu1 }
 0x3a7   : > { %v2423_v61 = vadd.f32 %v2422_v33, %v2333_v32  ;;  %v2248_v4 = vadd.f32 %v2247_v0, %v2158_v54 }
 0x3a9   : > { %v3097_v1 = vpack.c.bf16 %v2423_v61, %v2245_v60 }
 0x3ab   : > { %3193 = vst [vmem:[%s4454_s19 + $0x298] sm:$0xff] %v3097_v1 }
 0x3ad   : > { %v2336_v38 = vpop.f32.mrf.mxu2  ;;  %v2160_v24 = vpop.f32.mrf.mxu0 }
 0x3ae   : > { %v2425_v41 = vpop.f32.mrf.mxu3  ;;  %v2249_v6 = vpop.f32.mrf.mxu1 }
 0x3af   : > { %v2426_v22 = vadd.f32 %v2425_v41, %v2336_v38  ;;  %v2250_v13 = vadd.f32 %v2249_v6, %v2160_v24 }
 0x3b1   : > { %v3100_v7 = vpack.c.bf16 %v2426_v22, %v2248_v4 }
 0x3b3   : > { %3196 = vst [vmem:[%s4454_s19 + $0x2b0] sm:$0xff] %v3100_v7 }
 0x3b5   : > { %v2338_v10 = vpop.f32.mrf.mxu2  ;;  %v2163_v53 = vpop.f32.mrf.mxu0 }
 0x3b6   : > { %v2427_v12 = vpop.f32.mrf.mxu3  ;;  %v2252_v8 = vpop.f32.mrf.mxu1 }
 0x3b7   : > { %v2428_v14 = vadd.f32 %v2427_v12, %v2338_v10  ;;  %v2253_v9 = vadd.f32 %v2252_v8, %v2163_v53 }
 0x3b9   : > { %v3103_v52 = vpack.c.bf16 %v2428_v14, %v2250_v13 }
 0x3bb   : > { %3199 = vst [vmem:[%s4454_s19 + $0x2c8] sm:$0xff] %v3103_v52 }
 0x3bd   : > { %v2341_v21 = vpop.f32.mrf.mxu2  ;;  %v2165_v57 = vpop.f32.mrf.mxu0 }
 0x3be   : > { %v2430_v31 = vpop.f32.mrf.mxu3  ;;  %v2254_v63 = vpop.f32.mrf.mxu1 }
 0x3bf   : > { %v2431_v16 = vadd.f32 %v2430_v31, %v2341_v21  ;;  %v2255_v25 = vadd.f32 %v2254_v63, %v2165_v57 }
 0x3c1   : > { %v3106_v18 = vpack.c.bf16 %v2431_v16, %v2253_v9 }
 0x3c3   : > { %3202 = vst [vmem:[%s4454_s19 + $0x2e0] sm:$0xff] %v3106_v18 }
 0x3c5   : > { %v2343_v19 = vpop.f32.mrf.mxu2 }
 0x3c6   : > { %v2432_v20 = vpop.f32.mrf.mxu3 }
 0x3c7   : > { %v2433_v28 = vadd.f32 %v2432_v20, %v2343_v19 }
 0x3c9   : > { %v3109_v30 = vpack.c.bf16 %v2433_v28, %v2255_v25 }
 0x3cb   : > { %3205 = vst [vmem:[%s4454_s19 + $0x2f8] sm:$0xff] %v3109_v30 }
 0x3cc   : > { %4146 = shalt.err (!%p4143_p12)
}
 0x3cd   : > { %s4212_s30 = smov 384   ;;  %s4213_s7 = smov 24  }
 0x3ce   : > { %3986 = dma.vmem_to_hbm [thread:$0]  (%p4307_p3), %s3221_s21, 12288, %s3223_s22, %s3207_s12, %s4212_s30, %s4212_s30, %s4213_s7  }
 0x3cf PF: > { %p4003_p13 = scmp.ge.s32.totalorder %s4205_s14, 2  ;;  %s3237_s15 = sand.u32 1, %s4185_s9  }
 0x3d0   : > { %s3238_s17 = scalar_lea.sflag [#allocation5], %s3237_s15 }
 0x3d1   : > { %p3997_p0 = pnand %p4003_p13, %p4278_p6 }
 0x3d3   : > { %p3998_p5 = pneg %p3997_p0 }
 0x3d5   : > { %4180 = dma.done.wait (%p3998_p5), %s3238_s17, 12288  }
 0x3d6   : > { %4182 = vsyncadd (%p3998_p5), %s3238_s17, 4294955008  ;;  %s19_s14 = sadd.s32 1, %s4205_s14   ;;  %s4808_s9 = smov %s4189_s10 }
 0x3d7   : > { %p16_p7 = scmp.ge.s32.totalorder %s19_s14, 6   ;;  %s4809_s10 = smov %s4193_s11 }
 0x3d8   : > { %s4810_s11 = smov %s4316_s8  ;;  %s4811_s12 = smov %s4201_s13 }
 0x3d9   : > { %s4812_s13 = smov %s4814_s29  ;;  %18 = sbr.rel (!%p16_p7) target bundleno = 7 (0x7), region = 86 }
 0x3de   :  { %3244 = vsyncpa [#allocation4], 1 }
 0x3df   :  { %3246 = vsyncpa [#allocation4 + $0x1], 1 }
 0x3e0   :  { %3247 = vsyncpa [#allocation7], 1 }
 0x3e1   :  { %3248 = vsyncpa [#allocation5], 1 }
 0x3e2   :  { %3250 = vsyncpa [#allocation5 + $0x1], 1 }

</bundles_post_ra>
